<compile_context>
chip_gen: v7x
topology: tpu7x:2x2x1
jax: 0.10.0
libtpu: 0.0.40
codegen_flags: <defaults>
</compile_context>

<pallas_src>
import math

import jax
import jax.numpy as jnp
from jax.experimental import pallas as pl
from jax.experimental.pallas import tpu as pltpu


# ---------------------------------------------------------------------------
# VMEM budgeting / tile selection helpers
# ---------------------------------------------------------------------------
_VMEM_LIMIT_CACHE = None


def _vmem_limit_bytes():
    """Generation-aware VMEM limit (~3/4 of physical, capped at 100 MiB)."""
    global _VMEM_LIMIT_CACHE
    if _VMEM_LIMIT_CACHE is None:
        try:
            cap = int(pltpu.get_tpu_info().vmem_capacity_bytes)
        except Exception:
            cap = 64 * 1024 * 1024  # conservative (v7x per-TC VMEM)
        _VMEM_LIMIT_CACHE = int(min(cap * 3 // 4, 100 * 1024 * 1024))
    return _VMEM_LIMIT_CACHE


def _divisors(n):
    return [d for d in range(1, n + 1) if n % d == 0]


def _pick_conv_row_tile(N, Ho, Wo, C, Cop, isz, osz, resident_wb):
    """Pick THo (rows of output per grid step) for the conv kernel."""
    limit = _vmem_limit_bytes()
    nbuf = 1 if resident_wb else 2
    fixed = nbuf * (9 * C * Cop * isz + Cop * 4)
    budget = max(limit * 4 // 5 - fixed, 1)

    def step_bytes(t):
        x_main = 2 * t * (Wo + 1) * 2 * C * isz         # one input buffer
        x_halo = (Wo + 1) * 2 * C * isz
        out = t * Wo * Cop * osz
        acc = t * Wo * Cop * 4                          # f32 accumulators
        # 2x for double-buffered pipeline slabs, ~3x input for in-kernel tap
        # reshapes / dot partials, 2x acc headroom.
        return 2 * (x_main + x_halo + out) + 3 * x_main + 2 * acc

    legal = [d for d in _divisors(Ho) if d == Ho or (d * Wo) % 8 == 0]
    fit = [d for d in legal if d * Wo <= 4096 and step_bytes(d) <= budget]

    def pref(d):
        # Prefer an even >=2 parallel split (v7x 2-TC balance), then big tiles.
        steps = N * (Ho // d)
        return (steps >= 2 and steps % 2 == 0, d)

    if fit:
        return max(fit, key=pref)
    # No divisor meets the budget: take the cheapest *layout-legal* tile (never
    # the old "fall back to Ho regardless of size" behaviour).
    return min(legal, key=step_bytes)


def _pick_pool_tile(C, Ho, Wo, isz):
    """Pick (TC, THo) for the avg-pool kernel; THo chosen first."""
    budget = _vmem_limit_bytes() * 4 // 5
    legal_tho = [t for t in _divisors(Ho)
                 if t == Ho or (t % 8 == 0 and (t * Wo) % 128 == 0)]
    legal_tc = [d for d in _divisors(C) if d == C or d % 8 == 0]

    def step_bytes(tc, t):
        xin = tc * t * 4 * Wo * isz       # 2W = 4*Wo lanes
        out = tc * t * Wo * isz
        acc = tc * t * Wo * 4
        return 2 * (xin + out) + xin + 2 * acc

    for t in sorted(legal_tho, reverse=True):
        for tc in sorted(legal_tc, reverse=True):
            if step_bytes(tc, t) <= budget:
                return tc, t
    return min(legal_tc), min(legal_tho)


# ---------------------------------------------------------------------------
# 3x3 / stride-2 / pad-1 convolution
# ---------------------------------------------------------------------------
def _conv_down_kernel(xm_ref, xe_ref, w_ref, b_ref, o_ref):
    """One (batch, row-tile) step of the strided conv.

    xm_ref: (1, 2, THo, Wo+1, 2C)  H-parity rows [t*THo, t*THo+THo) of the
                                   padded input; lane q = (w%2)*C + c folds the
                                   W-parity into the channel dim.
    xe_ref: (1, 1, 1, Wo+1, 2C)    halo row t*THo+THo at H-parity 0 (kh=2 taps).
    w_ref : (9C, Cop)              weight, (kh, kw, cin) row-major, Cout padded
                                   to a multiple of 128 lanes (VMEM-resident).
    b_ref : (1, Cop)               f32 bias (padded, VMEM-resident).
    o_ref : (1, THo*Wo, Cop)       lane-dense output slab.
    """
    _, _, tho, wp1, twoc = xm_ref.shape
    wo = wp1 - 1
    c = twoc // 2

    def taps(slab):
        rows = slab.shape[0] * wo
        # kw=0,1 (folded in lanes) and kw=2 pieces of the im2col patch.
        return (slab[:, :wo, :].reshape(rows, 2 * c),
                slab[:, 1:, :c].reshape(rows, c))

    def contrib(slab, kh):
        a, b = taps(slab)
        return (jnp.dot(a, w_ref[3 * kh * c:(3 * kh + 2) * c, :],
                        preferred_element_type=jnp.float32)
                + jnp.dot(b, w_ref[(3 * kh + 2) * c:(3 * kh + 3) * c, :],
                          preferred_element_type=jnp.float32))

    slab0 = xm_ref[0, 0]          # H-parity 0 rows of this tile (kh=0 taps)
    slab1 = xm_ref[0, 1]          # H-parity 1 rows of this tile (kh=1 taps)
    halo = xe_ref[0, 0]           # first H-parity-0 row below the tile (kh=2)

    bias = b_ref[...]
    acc01 = contrib(slab0, 0) + contrib(slab1, 1)      # (THo*Wo, Cop)

    # kh=2 taps: output row r uses padded row 2r+2 = slab0[r+1] for the tile
    # interior and the halo row for the last output row.  Writing the two row
    # ranges separately avoids materialising a (THo, Wo+1, 2C) concatenated
    # copy in VMEM every grid step.
    acc_last = contrib(halo, 2)                         # (Wo, Cop)
    if tho > 1:
        acc_int = contrib(slab0[1:], 2)                 # ((THo-1)*Wo, Cop)
        k = (tho - 1) * wo
        o_ref[0, :k, :] = (acc01[:k] + acc_int + bias).astype(o_ref.dtype)
        o_ref[0, k:, :] = (acc01[k:] + acc_last + bias).astype(o_ref.dtype)
    else:
        o_ref[0] = (acc01 + acc_last + bias).astype(o_ref.dtype)


def _conv_downsample(x, weight, bias, *, resident_wb=True, mxu_dtype=None):
    N, C, H, W = x.shape
    Ho, Wo = H // 2, W // 2
    Co = weight.shape[-1]
    Cop = ((Co + 127) // 128) * 128
    out_dt = x.dtype
    cdt = jnp.dtype(mxu_dtype) if mxu_dtype is not None else jnp.dtype(out_dt)
    isz = cdt.itemsize
    osz = jnp.dtype(out_dt).itemsize

    # One fused relayout pass (under jit): NCHW -> zero-padded parity view
    # (N, 2, Ho+1, Wo+1, 2C).  The W-parity fold is a free (bitcast) reshape.
    # TODO(synk): offer an NHWC-in/NHWC-out fast path to drop both boundary
    # transposes for NHWC-friendly callers.
    x_nhwc = jnp.transpose(x, (0, 2, 3, 1)).astype(cdt)
    x_pad = jnp.pad(x_nhwc, ((0, 0), (1, 1), (1, 1), (0, 0)))
    xw = x_pad.reshape(N, H + 2, Wo + 1, 2 * C)
    x_view = xw.reshape(N, Ho + 1, 2, Wo + 1, 2 * C).transpose(0, 2, 1, 3, 4)

    # Weight (kh, kw, cin, cout) -> (9C, Cop); bias stays f32 for the acc add.
    w2d = weight.reshape(9 * C, Co).astype(cdt)
    b1d = bias.astype(jnp.float32)
    if Cop != Co:
        w2d = jnp.pad(w2d, ((0, 0), (0, Cop - Co)))
        b1d = jnp.pad(b1d, (0, Cop - Co))
    b2d = b1d.reshape(1, Cop)

    THo = _pick_conv_row_tile(N, Ho, Wo, C, Cop, isz, osz, resident_wb)
    Tn = Ho // THo

    if resident_wb:
        # Grid-invariant operands: single-buffered, fully VMEM-resident.
        # TODO(synk): very large weights (> ~1/3 VMEM on v7x) would need a
        # K-reduction grid axis instead of full residency.
        w_spec = pl.BlockSpec(memory_space=pltpu.MemorySpace.VMEM)
        b_spec = pl.BlockSpec(memory_space=pltpu.MemorySpace.VMEM)
    else:
        w_spec = pl.BlockSpec((9 * C, Cop), lambda n, t: (0, 0))
        b_spec = pl.BlockSpec((1, Cop), lambda n, t: (0, 0))

    out = pl.pallas_call(
        _conv_down_kernel,
        out_shape=jax.ShapeDtypeStruct((N, Ho * Wo, Cop), out_dt),
        grid=(N, Tn),
        in_specs=[
            # Main rows of this tile (both H-parities).
            pl.BlockSpec((1, 2, THo, Wo + 1, 2 * C),
                         lambda n, t: (n, 0, t, 0, 0)),
            # Single halo row (H-parity 0) just below the tile.
            pl.BlockSpec((1, 1, 1, Wo + 1, 2 * C),
                         lambda n, t: (n, 0, (t + 1) * THo, 0, 0)),
            w_spec,
            b_spec,
        ],
        out_specs=pl.BlockSpec((1, THo * Wo, Cop), lambda n, t: (n, t, 0)),
        compiler_params=pltpu.CompilerParams(
            dimension_semantics=("parallel", "parallel"),
            vmem_limit_bytes=_vmem_limit_bytes()),
    )(x_view, x_view, w2d, b2d)

    y = out[:, :, :Co].reshape(N, Ho, Wo, Co)
    return jnp.transpose(y, (0, 3, 1, 2))


# ---------------------------------------------------------------------------
# 2x2 / stride-2 average pool (NCHW, single pass)
# ---------------------------------------------------------------------------
def _avg_pool_kernel(x_ref, pw_ref, o_ref):
    """x_ref: (1, TC, THo, 2W) with lane q = (h%2)*W + w (row pairs folded into
    lanes); pw_ref: (2W, Wo) pooling matrix (0.25 on row-parity/column-pair
    taps); o_ref: (1, TC, THo*Wo) lane-dense output slab."""
    _, tc, tho, w2 = x_ref.shape
    wo = pw_ref.shape[1]
    rows = tc * tho
    # Row-pair sum + column-pair average in one MXU dot, f32 accumulation.
    acc = jnp.dot(x_ref[0].reshape(rows, w2), pw_ref[...],
                  preferred_element_type=jnp.float32)
    o_ref[0] = acc.reshape(tc, tho * wo).astype(o_ref.dtype)


def _avg_pool_downsample(x):
    N, C, H, W = x.shape
    Ho, Wo = H // 2, W // 2
    dt = x.dtype
    isz = jnp.dtype(dt).itemsize

    # Free (bitcast) reshape: fold the H row-parity into the lane dim.
    x2 = x.reshape(N, C, Ho, 2 * W)
    # (2W, Wo) pooling matrix: pw[m, j] = 0.25 iff (m % W) // 2 == j.
    m = jnp.arange(2 * W)
    pw = (0.25 * ((m % W)[:, None] // 2 == jnp.arange(Wo)[None, :])).astype(dt)

    TC, THo = _pick_pool_tile(C, Ho, Wo, isz)

    out = pl.pallas_call(
        _avg_pool_kernel,
        out_shape=jax.ShapeDtypeStruct((N, C, Ho * Wo), dt),
        grid=(N, C // TC, Ho // THo),
        in_specs=[
            pl.BlockSpec((1, TC, THo, 2 * W), lambda n, c, t: (n, c, t, 0)),
            pl.BlockSpec((2 * W, Wo), lambda n, c, t: (0, 0)),
        ],
        out_specs=pl.BlockSpec((1, TC, THo * Wo), lambda n, c, t: (n, c, t)),
        compiler_params=pltpu.CompilerParams(
            dimension_semantics=("parallel", "parallel", "parallel"),
            vmem_limit_bytes=_vmem_limit_bytes()),
    )(x2, pw)

    return out.reshape(N, C, Ho, Wo)


# ---------------------------------------------------------------------------
# Module wrapper
# ---------------------------------------------------------------------------
class Downsample:
    """JAX/Pallas port of the PyTorch Downsample module (dims=2 only).

    mxu_dtype: optional compute dtype (e.g. jnp.bfloat16) for the conv MXU
    operands; default None preserves the input dtype (f32 bit-accuracy).
    """

    def __init__(self, channels, use_conv, dims=2, out_channels=None, key=None,
                 mxu_dtype=None):
        assert dims == 2, "only dims=2 is implemented"
        # TODO(synk): dims=1 and dims=3 conv/pool variants are not implemented.
        self.channels = channels
        self.out_channels = out_channels or channels
        self.use_conv = use_conv
        self.mxu_dtype = mxu_dtype
        if use_conv:
            key = jax.random.PRNGKey(0) if key is None else key
            kw_key, kb_key = jax.random.split(key)
            fan_in = channels * 3 * 3
            bound = 1.0 / math.sqrt(fan_in)  # PyTorch Conv2d default init range
            # Weight stored as (kh, kw, Cin, Cout).
            self.weight = jax.random.uniform(
                kw_key, (3, 3, channels, self.out_channels), jnp.float32,
                minval=-bound, maxval=bound)
            self.bias = jax.random.uniform(
                kb_key, (self.out_channels,), jnp.float32,
                minval=-bound, maxval=bound)
            self._fwd_fast = jax.jit(
                lambda xv, wv, bv: _conv_downsample(
                    xv, wv, bv, resident_wb=True, mxu_dtype=mxu_dtype))
            self._fwd_safe = jax.jit(
                lambda xv, wv, bv: _conv_downsample(
                    xv, wv, bv, resident_wb=False, mxu_dtype=mxu_dtype))
        else:
            assert self.channels == self.out_channels
            self.weight = None
            self.bias = None
            self._fwd_fast = jax.jit(_avg_pool_downsample)
            self._fwd_safe = self._fwd_fast
        self._use_fast = True

    def __call__(self, x):
        assert x.shape[1] == self.channels
        H, W = x.shape[2], x.shape[3]
        assert H % 2 == 0 and W % 2 == 0, "even spatial dims required"
        # TODO(synk): odd spatial sizes (PyTorch floor semantics) not handled.
        args = (x, self.weight, self.bias) if self.use_conv else (x,)
        if self._use_fast:
            try:
                return self._fwd_fast(*args)
            except Exception:
                # Fall back to double-buffered weight/bias specs if the
                # VMEM-resident fast path fails to lower on this backend.
                self._use_fast = False
        return self._fwd_safe(*args)


if __name__ == "__main__":
    key = jax.random.PRNGKey(0)
    kx, kp = jax.random.split(key)

    N, C, H, W = 2, 4, 16, 16
    x = jax.random.normal(kx, (N, C, H, W), jnp.float32)

    # ---- conv path (use_conv=True) ----
    ds_conv = Downsample(channels=C, use_conv=True, dims=2, key=kp)
    y_conv = jax.block_until_ready(ds_conv(x))
    assert y_conv.shape == (N, C, H // 2, W // 2)
    assert y_conv.dtype == x.dtype

    w_oihw = jnp.transpose(ds_conv.weight, (3, 2, 0, 1))  # (Co, Ci, kh, kw)
    ref_conv = jax.lax.conv_general_dilated(
        x, w_oihw, window_strides=(2, 2), padding=((1, 1), (1, 1)),
        dimension_numbers=("NCHW", "OIHW", "NCHW"))
    ref_conv = ref_conv + ds_conv.bias.reshape(1, -1, 1, 1)
    assert jnp.allclose(y_conv, ref_conv, atol=2e-4, rtol=2e-4), "conv mismatch"

    # ---- avg-pool path (use_conv=False) ----
    ds_pool = Downsample(channels=C, use_conv=False, dims=2)
    y_pool = jax.block_until_ready(ds_pool(x))
    ref_pool = x.reshape(N, C, H // 2, 2, W // 2, 2).mean(axis=(3, 5))
    assert y_pool.shape == ref_pool.shape
    assert jnp.allclose(y_pool, ref_pool, atol=1e-4, rtol=1e-4), "pool mismatch"

    print("KERNEL_OK")
</pallas_src>

<mosaic_0001>
module attributes {stable_mosaic.version = 11 : i64} {
  func.func @_conv_down_kernel(%arg0: i32, %arg1: i32, %arg2: memref<1x2x8x9x8xf32, #tpu.memory_space<vmem>>, %arg3: memref<1x1x1x9x8xf32, #tpu.memory_space<vmem>>, %arg4: memref<36x128xf32, #tpu.memory_space<vmem>>, %arg5: memref<1x128xf32, #tpu.memory_space<vmem>>, %arg6: memref<1x64x128xf32, #tpu.memory_space<vmem>>) attributes {dimension_semantics = [#tpu.dimension_semantics<parallel>, #tpu.dimension_semantics<parallel>], iteration_bounds = array<i64: 2, 1>, scalar_prefetch = 0 : i64, scratch_operands = 0 : i64, tpu.core_type = #tpu.core_type<tc>, window_params = [{transform_indices = @transform_0, window_bounds = array<i64: 1, 2, 8, 9, 8>}, {transform_indices = @transform_1, window_bounds = array<i64: 1, 1, 1, 9, 8>}, {pipeline_mode = #tpu.pipeline_mode<synchronous>, transform_indices = @transform_2, window_bounds = array<i64: 36, 128>}, {pipeline_mode = #tpu.pipeline_mode<synchronous>, transform_indices = @transform_3, window_bounds = array<i64: 1, 128>}, {transform_indices = @transform_4, window_bounds = array<i64: 1, 64, 128>}]} {
    %c0 = arith.constant 0 : index
    %c0_0 = arith.constant 0 : index
    %c0_1 = arith.constant 0 : index
    %c0_2 = arith.constant 0 : index
    %c0_3 = arith.constant 0 : index
    %0 = vector.load %arg2[%c0, %c0_0, %c0_1, %c0_2, %c0_3] : memref<1x2x8x9x8xf32, #tpu.memory_space<vmem>>, vector<1x1x8x9x8xf32>
    %1 = vector.shape_cast %0 : vector<1x1x8x9x8xf32> to vector<8x9x8xf32>
    %c0_4 = arith.constant 0 : index
    %c1 = arith.constant 1 : index
    %c0_5 = arith.constant 0 : index
    %c0_6 = arith.constant 0 : index
    %c0_7 = arith.constant 0 : index
    %2 = vector.load %arg2[%c0_4, %c1, %c0_5, %c0_6, %c0_7] : memref<1x2x8x9x8xf32, #tpu.memory_space<vmem>>, vector<1x1x8x9x8xf32>
    %3 = vector.shape_cast %2 : vector<1x1x8x9x8xf32> to vector<8x9x8xf32>
    %c0_8 = arith.constant 0 : index
    %c0_9 = arith.constant 0 : index
    %c0_10 = arith.constant 0 : index
    %c0_11 = arith.constant 0 : index
    %c0_12 = arith.constant 0 : index
    %4 = vector.load %arg3[%c0_8, %c0_9, %c0_10, %c0_11, %c0_12] : memref<1x1x1x9x8xf32, #tpu.memory_space<vmem>>, vector<1x1x1x9x8xf32>
    %5 = vector.shape_cast %4 : vector<1x1x1x9x8xf32> to vector<1x9x8xf32>
    %c0_13 = arith.constant 0 : index
    %c0_14 = arith.constant 0 : index
    %6 = vector.load %arg5[%c0_13, %c0_14] : memref<1x128xf32, #tpu.memory_space<vmem>>, vector<1x128xf32>
    %7 = vector.extract_strided_slice %1 {offsets = [0, 0, 0], sizes = [8, 8, 8], strides = [1, 1, 1]} : vector<8x9x8xf32> to vector<8x8x8xf32>
    %8 = vector.shape_cast %7 : vector<8x8x8xf32> to vector<64x8xf32>
    %9 = vector.extract_strided_slice %1 {offsets = [0, 1, 0], sizes = [8, 8, 4], strides = [1, 1, 1]} : vector<8x9x8xf32> to vector<8x8x4xf32>
    %10 = vector.shape_cast %9 : vector<8x8x4xf32> to vector<64x4xf32>
    %c0_15 = arith.constant 0 : index
    %c0_16 = arith.constant 0 : index
    %11 = vector.load %arg4[%c0_15, %c0_16] : memref<36x128xf32, #tpu.memory_space<vmem>>, vector<8x128xf32>
    %cst = arith.constant dense<0.000000e+00> : vector<64x128xf32>
    %12 = tpu.matmul %8, %11, %cst {dimension_numbers = #tpu.dot_dimension_numbers<[1], [0], [0], [1], [0, 0, 1, 1], [], []>} : vector<64x8xf32>, vector<8x128xf32>, vector<64x128xf32> -> vector<64x128xf32>
    %c8 = arith.constant 8 : index
    %c0_17 = arith.constant 0 : index
    %13 = vector.load %arg4[%c8, %c0_17] : memref<36x128xf32, #tpu.memory_space<vmem>>, vector<4x128xf32>
    %cst_18 = arith.constant dense<0.000000e+00> : vector<64x128xf32>
    %14 = tpu.matmul %10, %13, %cst_18 {dimension_numbers = #tpu.dot_dimension_numbers<[1], [0], [0], [1], [0, 0, 1, 1], [], []>} : vector<64x4xf32>, vector<4x128xf32>, vector<64x128xf32> -> vector<64x128xf32>
    %15 = arith.addf %12, %14 : vector<64x128xf32>
    %16 = vector.extract_strided_slice %3 {offsets = [0, 0, 0], sizes = [8, 8, 8], strides = [1, 1, 1]} : vector<8x9x8xf32> to vector<8x8x8xf32>
    %17 = vector.shape_cast %16 : vector<8x8x8xf32> to vector<64x8xf32>
    %18 = vector.extract_strided_slice %3 {offsets = [0, 1, 0], sizes = [8, 8, 4], strides = [1, 1, 1]} : vector<8x9x8xf32> to vector<8x8x4xf32>
    %19 = vector.shape_cast %18 : vector<8x8x4xf32> to vector<64x4xf32>
    %c12 = arith.constant 12 : index
    %c0_19 = arith.constant 0 : index
    %20 = vector.load %arg4[%c12, %c0_19] : memref<36x128xf32, #tpu.memory_space<vmem>>, vector<8x128xf32>
    %cst_20 = arith.constant dense<0.000000e+00> : vector<64x128xf32>
    %21 = tpu.matmul %17, %20, %cst_20 {dimension_numbers = #tpu.dot_dimension_numbers<[1], [0], [0], [1], [0, 0, 1, 1], [], []>} : vector<64x8xf32>, vector<8x128xf32>, vector<64x128xf32> -> vector<64x128xf32>
    %c20 = arith.constant 20 : index
    %c0_21 = arith.constant 0 : index
    %22 = vector.load %arg4[%c20, %c0_21] : memref<36x128xf32, #tpu.memory_space<vmem>>, vector<4x128xf32>
    %cst_22 = arith.constant dense<0.000000e+00> : vector<64x128xf32>
    %23 = tpu.matmul %19, %22, %cst_22 {dimension_numbers = #tpu.dot_dimension_numbers<[1], [0], [0], [1], [0, 0, 1, 1], [], []>} : vector<64x4xf32>, vector<4x128xf32>, vector<64x128xf32> -> vector<64x128xf32>
    %24 = arith.addf %21, %23 : vector<64x128xf32>
    %25 = arith.addf %15, %24 : vector<64x128xf32>
    %26 = vector.extract_strided_slice %5 {offsets = [0, 0, 0], sizes = [1, 8, 8], strides = [1, 1, 1]} : vector<1x9x8xf32> to vector<1x8x8xf32>
    %27 = vector.shape_cast %26 : vector<1x8x8xf32> to vector<8x8xf32>
    %28 = vector.extract_strided_slice %5 {offsets = [0, 1, 0], sizes = [1, 8, 4], strides = [1, 1, 1]} : vector<1x9x8xf32> to vector<1x8x4xf32>
    %29 = vector.shape_cast %28 : vector<1x8x4xf32> to vector<8x4xf32>
    %c24 = arith.constant 24 : index
    %c0_23 = arith.constant 0 : index
    %30 = vector.load %arg4[%c24, %c0_23] : memref<36x128xf32, #tpu.memory_space<vmem>>, vector<8x128xf32>
    %cst_24 = arith.constant dense<0.000000e+00> : vector<8x128xf32>
    %31 = tpu.matmul %27, %30, %cst_24 {dimension_numbers = #tpu.dot_dimension_numbers<[1], [0], [0], [1], [0, 0, 1, 1], [], []>} : vector<8x8xf32>, vector<8x128xf32>, vector<8x128xf32> -> vector<8x128xf32>
    %c32 = arith.constant 32 : index
    %c0_25 = arith.constant 0 : index
    %32 = vector.load %arg4[%c32, %c0_25] : memref<36x128xf32, #tpu.memory_space<vmem>>, vector<4x128xf32>
    %cst_26 = arith.constant dense<0.000000e+00> : vector<8x128xf32>
    %33 = tpu.matmul %29, %32, %cst_26 {dimension_numbers = #tpu.dot_dimension_numbers<[1], [0], [0], [1], [0, 0, 1, 1], [], []>} : vector<8x4xf32>, vector<4x128xf32>, vector<8x128xf32> -> vector<8x128xf32>
    %34 = arith.addf %31, %33 : vector<8x128xf32>
    %35 = vector.extract_strided_slice %1 {offsets = [1, 0, 0], sizes = [7, 9, 8], strides = [1, 1, 1]} : vector<8x9x8xf32> to vector<7x9x8xf32>
    %36 = vector.extract_strided_slice %35 {offsets = [0, 0, 0], sizes = [7, 8, 8], strides = [1, 1, 1]} : vector<7x9x8xf32> to vector<7x8x8xf32>
    %37 = vector.shape_cast %36 : vector<7x8x8xf32> to vector<56x8xf32>
    %38 = vector.extract_strided_slice %35 {offsets = [0, 1, 0], sizes = [7, 8, 4], strides = [1, 1, 1]} : vector<7x9x8xf32> to vector<7x8x4xf32>
    %39 = vector.shape_cast %38 : vector<7x8x4xf32> to vector<56x4xf32>
    %c24_27 = arith.constant 24 : index
    %c0_28 = arith.constant 0 : index
    %40 = vector.load %arg4[%c24_27, %c0_28] : memref<36x128xf32, #tpu.memory_space<vmem>>, vector<8x128xf32>
    %cst_29 = arith.constant dense<0.000000e+00> : vector<56x128xf32>
    %41 = tpu.matmul %37, %40, %cst_29 {dimension_numbers = #tpu.dot_dimension_numbers<[1], [0], [0], [1], [0, 0, 1, 1], [], []>} : vector<56x8xf32>, vector<8x128xf32>, vector<56x128xf32> -> vector<56x128xf32>
    %c32_30 = arith.constant 32 : index
    %c0_31 = arith.constant 0 : index
    %42 = vector.load %arg4[%c32_30, %c0_31] : memref<36x128xf32, #tpu.memory_space<vmem>>, vector<4x128xf32>
    %cst_32 = arith.constant dense<0.000000e+00> : vector<56x128xf32>
    %43 = tpu.matmul %39, %42, %cst_32 {dimension_numbers = #tpu.dot_dimension_numbers<[1], [0], [0], [1], [0, 0, 1, 1], [], []>} : vector<56x4xf32>, vector<4x128xf32>, vector<56x128xf32> -> vector<56x128xf32>
    %44 = arith.addf %41, %43 : vector<56x128xf32>
    %45 = vector.extract_strided_slice %25 {offsets = [0, 0], sizes = [56, 128], strides = [1, 1]} : vector<64x128xf32> to vector<56x128xf32>
    %46 = arith.addf %45, %44 : vector<56x128xf32>
    %47 = vector.broadcast %6 : vector<1x128xf32> to vector<56x128xf32>
    %48 = arith.addf %46, %47 : vector<56x128xf32>
    %c0_33 = arith.constant 0 : index
    %c0_34 = arith.constant 0 : index
    %c0_35 = arith.constant 0 : index
    %49 = vector.load %arg6[%c0_33, %c0_34, %c0_35] : memref<1x64x128xf32, #tpu.memory_space<vmem>>, vector<1x56x128xf32>
    %50 = vector.shape_cast %49 : vector<1x56x128xf32> to vector<56x128xf32>
    %51 = vector.shape_cast %48 : vector<56x128xf32> to vector<1x56x128xf32>
    tpu.vector_store %arg6[%c0_33, %c0_34, %c0_35], %51 {strides = array<i32>} : memref<1x64x128xf32, #tpu.memory_space<vmem>>, vector<1x56x128xf32>,
    %52 = vector.extract_strided_slice %25 {offsets = [56, 0], sizes = [8, 128], strides = [1, 1]} : vector<64x128xf32> to vector<8x128xf32>
    %53 = arith.addf %52, %34 : vector<8x128xf32>
    %54 = vector.broadcast %6 : vector<1x128xf32> to vector<8x128xf32>
    %55 = arith.addf %53, %54 : vector<8x128xf32>
    %c0_36 = arith.constant 0 : index
    %c56 = arith.constant 56 : index
    %c0_37 = arith.constant 0 : index
    %56 = vector.load %arg6[%c0_36, %c56, %c0_37] : memref<1x64x128xf32, #tpu.memory_space<vmem>>, vector<1x8x128xf32>
    %57 = vector.shape_cast %56 : vector<1x8x128xf32> to vector<8x128xf32>
    %58 = vector.shape_cast %55 : vector<8x128xf32> to vector<1x8x128xf32>
    tpu.vector_store %arg6[%c0_36, %c56, %c0_37], %58 {strides = array<i32>} : memref<1x64x128xf32, #tpu.memory_space<vmem>>, vector<1x8x128xf32>,
    return
  }
  func.func @transform_0(%arg0: i32, %arg1: i32) -> (i32, i32, i32, i32, i32) {
    %c0_i32 = arith.constant 0 : i32
    %c0_i32_0 = arith.constant 0 : i32
    %c0_i32_1 = arith.constant 0 : i32
    %c0_i32_2 = arith.constant 0 : i32
    return %arg0, %c0_i32, %arg1, %c0_i32_0, %c0_i32_1 : i32, i32, i32, i32, i32
  }
  func.func @transform_1(%arg0: i32, %arg1: i32) -> (i32, i32, i32, i32, i32) {
    %c1_i32 = arith.constant 1 : i32
    %0 = arith.addi %arg1, %c1_i32 : i32
    %c8_i32 = arith.constant 8 : i32
    %1 = arith.muli %0, %c8_i32 : i32
    %c0_i32 = arith.constant 0 : i32
    %c0_i32_0 = arith.constant 0 : i32
    %c0_i32_1 = arith.constant 0 : i32
    %c0_i32_2 = arith.constant 0 : i32
    return %arg0, %c0_i32, %1, %c0_i32_0, %c0_i32_1 : i32, i32, i32, i32, i32
  }
  func.func @transform_2(%arg0: i32, %arg1: i32) -> (i32, i32) {
    %c0_i32 = arith.constant 0 : i32
    %c0_i32_0 = arith.constant 0 : i32
    %c0_i32_1 = arith.constant 0 : i32
    return %c0_i32, %c0_i32_0 : i32, i32
  }
  func.func @transform_3(%arg0: i32, %arg1: i32) -> (i32, i32) {
    %c0_i32 = arith.constant 0 : i32
    %c0_i32_0 = arith.constant 0 : i32
    %c0_i32_1 = arith.constant 0 : i32
    return %c0_i32, %c0_i32_0 : i32, i32
  }
  func.func @transform_4(%arg0: i32, %arg1: i32) -> (i32, i32, i32) {
    %c0_i32 = arith.constant 0 : i32
    %c0_i32_0 = arith.constant 0 : i32
    return %arg0, %arg1, %c0_i32 : i32, i32, i32
  }
}

module attributes {stable_mosaic.version = 11 : i64} {
  func.func @_conv_down_kernel(%arg0: i32, %arg1: i32, %arg2: memref<1x2x8x9x8xf32, #tpu.memory_space<vmem>>, %arg3: memref<1x1x1x9x8xf32, #tpu.memory_space<vmem>>, %arg4: memref<36x128xf32, #tpu.memory_space<vmem>>, %arg5: memref<1x128xf32, #tpu.memory_space<vmem>>, %arg6: memref<1x64x128xf32, #tpu.memory_space<vmem>>) attributes {dimension_semantics = [#tpu.dimension_semantics<parallel>, #tpu.dimension_semantics<parallel>], iteration_bounds = array<i64: 2, 1>, scalar_prefetch = 0 : i64, scratch_operands = 0 : i64, tpu.core_type = #tpu.core_type<tc>, window_params = [{transform_indices = @transform_0, window_bounds = array<i64: 1, 2, 8, 9, 8>}, {transform_indices = @transform_1, window_bounds = array<i64: 1, 1, 1, 9, 8>}, {pipeline_mode = #tpu.pipeline_mode<synchronous>, transform_indices = @transform_2, window_bounds = array<i64: 36, 128>}, {pipeline_mode = #tpu.pipeline_mode<synchronous>, transform_indices = @transform_3, window_bounds = array<i64: 1, 128>}, {transform_indices = @transform_4, window_bounds = array<i64: 1, 64, 128>}]} {
    %c0 = arith.constant 0 : index
    %c0_0 = arith.constant 0 : index
    %c0_1 = arith.constant 0 : index
    %c0_2 = arith.constant 0 : index
    %c0_3 = arith.constant 0 : index
    %0 = vector.load %arg2[%c0, %c0_0, %c0_1, %c0_2, %c0_3] : memref<1x2x8x9x8xf32, #tpu.memory_space<vmem>>, vector<1x1x8x9x8xf32>
    %1 = vector.shape_cast %0 : vector<1x1x8x9x8xf32> to vector<8x9x8xf32>
    %c0_4 = arith.constant 0 : index
    %c1 = arith.constant 1 : index
    %c0_5 = arith.constant 0 : index
    %c0_6 = arith.constant 0 : index
    %c0_7 = arith.constant 0 : index
    %2 = vector.load %arg2[%c0_4, %c1, %c0_5, %c0_6, %c0_7] : memref<1x2x8x9x8xf32, #tpu.memory_space<vmem>>, vector<1x1x8x9x8xf32>
    %3 = vector.shape_cast %2 : vector<1x1x8x9x8xf32> to vector<8x9x8xf32>
    %c0_8 = arith.constant 0 : index
    %c0_9 = arith.constant 0 : index
    %c0_10 = arith.constant 0 : index
    %c0_11 = arith.constant 0 : index
    %c0_12 = arith.constant 0 : index
    %4 = vector.load %arg3[%c0_8, %c0_9, %c0_10, %c0_11, %c0_12] : memref<1x1x1x9x8xf32, #tpu.memory_space<vmem>>, vector<1x1x1x9x8xf32>
    %5 = vector.shape_cast %4 : vector<1x1x1x9x8xf32> to vector<1x9x8xf32>
    %c0_13 = arith.constant 0 : index
    %c0_14 = arith.constant 0 : index
    %6 = vector.load %arg5[%c0_13, %c0_14] : memref<1x128xf32, #tpu.memory_space<vmem>>, vector<1x128xf32>
    %7 = vector.extract_strided_slice %1 {offsets = [0, 0, 0], sizes = [8, 8, 8], strides = [1, 1, 1]} : vector<8x9x8xf32> to vector<8x8x8xf32>
    %8 = vector.shape_cast %7 : vector<8x8x8xf32> to vector<64x8xf32>
    %9 = vector.extract_strided_slice %1 {offsets = [0, 1, 0], sizes = [8, 8, 4], strides = [1, 1, 1]} : vector<8x9x8xf32> to vector<8x8x4xf32>
    %10 = vector.shape_cast %9 : vector<8x8x4xf32> to vector<64x4xf32>
    %c0_15 = arith.constant 0 : index
    %c0_16 = arith.constant 0 : index
    %11 = vector.load %arg4[%c0_15, %c0_16] : memref<36x128xf32, #tpu.memory_space<vmem>>, vector<8x128xf32>
    %cst = arith.constant dense<0.000000e+00> : vector<64x128xf32>
    %12 = tpu.matmul %8, %11, %cst {dimension_numbers = #tpu.dot_dimension_numbers<[1], [0], [0], [1], [0, 0, 1, 1], [], []>} : vector<64x8xf32>, vector<8x128xf32>, vector<64x128xf32> -> vector<64x128xf32>
    %c8 = arith.constant 8 : index
    %c0_17 = arith.constant 0 : index
    %13 = vector.load %arg4[%c8, %c0_17] : memref<36x128xf32, #tpu.memory_space<vmem>>, vector<4x128xf32>
    %cst_18 = arith.constant dense<0.000000e+00> : vector<64x128xf32>
    %14 = tpu.matmul %10, %13, %cst_18 {dimension_numbers = #tpu.dot_dimension_numbers<[1], [0], [0], [1], [0, 0, 1, 1], [], []>} : vector<64x4xf32>, vector<4x128xf32>, vector<64x128xf32> -> vector<64x128xf32>
    %15 = arith.addf %12, %14 : vector<64x128xf32>
    %16 = vector.extract_strided_slice %3 {offsets = [0, 0, 0], sizes = [8, 8, 8], strides = [1, 1, 1]} : vector<8x9x8xf32> to vector<8x8x8xf32>
    %17 = vector.shape_cast %16 : vector<8x8x8xf32> to vector<64x8xf32>
    %18 = vector.extract_strided_slice %3 {offsets = [0, 1, 0], sizes = [8, 8, 4], strides = [1, 1, 1]} : vector<8x9x8xf32> to vector<8x8x4xf32>
    %19 = vector.shape_cast %18 : vector<8x8x4xf32> to vector<64x4xf32>
    %c12 = arith.constant 12 : index
    %c0_19 = arith.constant 0 : index
    %20 = vector.load %arg4[%c12, %c0_19] : memref<36x128xf32, #tpu.memory_space<vmem>>, vector<8x128xf32>
    %cst_20 = arith.constant dense<0.000000e+00> : vector<64x128xf32>
    %21 = tpu.matmul %17, %20, %cst_20 {dimension_numbers = #tpu.dot_dimension_numbers<[1], [0], [0], [1], [0, 0, 1, 1], [], []>} : vector<64x8xf32>, vector<8x128xf32>, vector<64x128xf32> -> vector<64x128xf32>
    %c20 = arith.constant 20 : index
    %c0_21 = arith.constant 0 : index
    %22 = vector.load %arg4[%c20, %c0_21] : memref<36x128xf32, #tpu.memory_space<vmem>>, vector<4x128xf32>
    %cst_22 = arith.constant dense<0.000000e+00> : vector<64x128xf32>
    %23 = tpu.matmul %19, %22, %cst_22 {dimension_numbers = #tpu.dot_dimension_numbers<[1], [0], [0], [1], [0, 0, 1, 1], [], []>} : vector<64x4xf32>, vector<4x128xf32>, vector<64x128xf32> -> vector<64x128xf32>
    %24 = arith.addf %21, %23 : vector<64x128xf32>
    %25 = arith.addf %15, %24 : vector<64x128xf32>
    %26 = vector.extract_strided_slice %5 {offsets = [0, 0, 0], sizes = [1, 8, 8], strides = [1, 1, 1]} : vector<1x9x8xf32> to vector<1x8x8xf32>
    %27 = vector.shape_cast %26 : vector<1x8x8xf32> to vector<8x8xf32>
    %28 = vector.extract_strided_slice %5 {offsets = [0, 1, 0], sizes = [1, 8, 4], strides = [1, 1, 1]} : vector<1x9x8xf32> to vector<1x8x4xf32>
    %29 = vector.shape_cast %28 : vector<1x8x4xf32> to vector<8x4xf32>
    %c24 = arith.constant 24 : index
    %c0_23 = arith.constant 0 : index
    %30 = vector.load %arg4[%c24, %c0_23] : memref<36x128xf32, #tpu.memory_space<vmem>>, vector<8x128xf32>
    %cst_24 = arith.constant dense<0.000000e+00> : vector<8x128xf32>
    %31 = tpu.matmul %27, %30, %cst_24 {dimension_numbers = #tpu.dot_dimension_numbers<[1], [0], [0], [1], [0, 0, 1, 1], [], []>} : vector<8x8xf32>, vector<8x128xf32>, vector<8x128xf32> -> vector<8x128xf32>
    %c32 = arith.constant 32 : index
    %c0_25 = arith.constant 0 : index
    %32 = vector.load %arg4[%c32, %c0_25] : memref<36x128xf32, #tpu.memory_space<vmem>>, vector<4x128xf32>
    %cst_26 = arith.constant dense<0.000000e+00> : vector<8x128xf32>
    %33 = tpu.matmul %29, %32, %cst_26 {dimension_numbers = #tpu.dot_dimension_numbers<[1], [0], [0], [1], [0, 0, 1, 1], [], []>} : vector<8x4xf32>, vector<4x128xf32>, vector<8x128xf32> -> vector<8x128xf32>
    %34 = arith.addf %31, %33 : vector<8x128xf32>
    %35 = vector.extract_strided_slice %1 {offsets = [1, 0, 0], sizes = [7, 9, 8], strides = [1, 1, 1]} : vector<8x9x8xf32> to vector<7x9x8xf32>
    %36 = vector.extract_strided_slice %35 {offsets = [0, 0, 0], sizes = [7, 8, 8], strides = [1, 1, 1]} : vector<7x9x8xf32> to vector<7x8x8xf32>
    %37 = vector.shape_cast %36 : vector<7x8x8xf32> to vector<56x8xf32>
    %38 = vector.extract_strided_slice %35 {offsets = [0, 1, 0], sizes = [7, 8, 4], strides = [1, 1, 1]} : vector<7x9x8xf32> to vector<7x8x4xf32>
    %39 = vector.shape_cast %38 : vector<7x8x4xf32> to vector<56x4xf32>
    %c24_27 = arith.constant 24 : index
    %c0_28 = arith.constant 0 : index
    %40 = vector.load %arg4[%c24_27, %c0_28] : memref<36x128xf32, #tpu.memory_space<vmem>>, vector<8x128xf32>
    %cst_29 = arith.constant dense<0.000000e+00> : vector<56x128xf32>
    %41 = tpu.matmul %37, %40, %cst_29 {dimension_numbers = #tpu.dot_dimension_numbers<[1], [0], [0], [1], [0, 0, 1, 1], [], []>} : vector<56x8xf32>, vector<8x128xf32>, vector<56x128xf32> -> vector<56x128xf32>
    %c32_30 = arith.constant 32 : index
    %c0_31 = arith.constant 0 : index
    %42 = vector.load %arg4[%c32_30, %c0_31] : memref<36x128xf32, #tpu.memory_space<vmem>>, vector<4x128xf32>
    %cst_32 = arith.constant dense<0.000000e+00> : vector<56x128xf32>
    %43 = tpu.matmul %39, %42, %cst_32 {dimension_numbers = #tpu.dot_dimension_numbers<[1], [0], [0], [1], [0, 0, 1, 1], [], []>} : vector<56x4xf32>, vector<4x128xf32>, vector<56x128xf32> -> vector<56x128xf32>
    %44 = arith.addf %41, %43 : vector<56x128xf32>
    %45 = vector.extract_strided_slice %25 {offsets = [0, 0], sizes = [56, 128], strides = [1, 1]} : vector<64x128xf32> to vector<56x128xf32>
    %46 = arith.addf %45, %44 : vector<56x128xf32>
    %47 = vector.broadcast %6 : vector<1x128xf32> to vector<56x128xf32>
    %48 = arith.addf %46, %47 : vector<56x128xf32>
    %c0_33 = arith.constant 0 : index
    %c0_34 = arith.constant 0 : index
    %c0_35 = arith.constant 0 : index
    %49 = vector.load %arg6[%c0_33, %c0_34, %c0_35] : memref<1x64x128xf32, #tpu.memory_space<vmem>>, vector<1x56x128xf32>
    %50 = vector.shape_cast %49 : vector<1x56x128xf32> to vector<56x128xf32>
    %51 = vector.shape_cast %48 : vector<56x128xf32> to vector<1x56x128xf32>
    tpu.vector_store %arg6[%c0_33, %c0_34, %c0_35], %51 {strides = array<i32>} : memref<1x64x128xf32, #tpu.memory_space<vmem>>, vector<1x56x128xf32>,
    %52 = vector.extract_strided_slice %25 {offsets = [56, 0], sizes = [8, 128], strides = [1, 1]} : vector<64x128xf32> to vector<8x128xf32>
    %53 = arith.addf %52, %34 : vector<8x128xf32>
    %54 = vector.broadcast %6 : vector<1x128xf32> to vector<8x128xf32>
    %55 = arith.addf %53, %54 : vector<8x128xf32>
    %c0_36 = arith.constant 0 : index
    %c56 = arith.constant 56 : index
    %c0_37 = arith.constant 0 : index
    %56 = vector.load %arg6[%c0_36, %c56, %c0_37] : memref<1x64x128xf32, #tpu.memory_space<vmem>>, vector<1x8x128xf32>
    %57 = vector.shape_cast %56 : vector<1x8x128xf32> to vector<8x128xf32>
    %58 = vector.shape_cast %55 : vector<8x128xf32> to vector<1x8x128xf32>
    tpu.vector_store %arg6[%c0_36, %c56, %c0_37], %58 {strides = array<i32>} : memref<1x64x128xf32, #tpu.memory_space<vmem>>, vector<1x8x128xf32>,
    return
  }
  func.func @transform_0(%arg0: i32, %arg1: i32) -> (i32, i32, i32, i32, i32) {
    %c0_i32 = arith.constant 0 : i32
    %c0_i32_0 = arith.constant 0 : i32
    %c0_i32_1 = arith.constant 0 : i32
    %c0_i32_2 = arith.constant 0 : i32
    return %arg0, %c0_i32, %arg1, %c0_i32_0, %c0_i32_1 : i32, i32, i32, i32, i32
  }
  func.func @transform_1(%arg0: i32, %arg1: i32) -> (i32, i32, i32, i32, i32) {
    %c1_i32 = arith.constant 1 : i32
    %0 = arith.addi %arg1, %c1_i32 : i32
    %c8_i32 = arith.constant 8 : i32
    %1 = arith.muli %0, %c8_i32 : i32
    %c0_i32 = arith.constant 0 : i32
    %c0_i32_0 = arith.constant 0 : i32
    %c0_i32_1 = arith.constant 0 : i32
    %c0_i32_2 = arith.constant 0 : i32
    return %arg0, %c0_i32, %1, %c0_i32_0, %c0_i32_1 : i32, i32, i32, i32, i32
  }
  func.func @transform_2(%arg0: i32, %arg1: i32) -> (i32, i32) {
    %c0_i32 = arith.constant 0 : i32
    %c0_i32_0 = arith.constant 0 : i32
    %c0_i32_1 = arith.constant 0 : i32
    return %c0_i32, %c0_i32_0 : i32, i32
  }
  func.func @transform_3(%arg0: i32, %arg1: i32) -> (i32, i32) {
    %c0_i32 = arith.constant 0 : i32
    %c0_i32_0 = arith.constant 0 : i32
    %c0_i32_1 = arith.constant 0 : i32
    return %c0_i32, %c0_i32_0 : i32, i32
  }
  func.func @transform_4(%arg0: i32, %arg1: i32) -> (i32, i32, i32) {
    %c0_i32 = arith.constant 0 : i32
    %c0_i32_0 = arith.constant 0 : i32
    return %arg0, %arg1, %c0_i32 : i32, i32, i32
  }
}

</mosaic_0001>

<bundles_post_ra>
// kernel: _lambda_.1
= control target key start
LH: loop header
LB: loop body
LE: loop exit
PB: predicated region body
PF: predicated region fallthrough
CT: control target
= control target key end

     0   :  { %s2149_s15 = smov 0   ;;  %s2151_s16 = smov 0   ;;  %s2539_s0 = inlined_call_operand.vmem [shape: f32[2,2,9,9,8], index: 0, kind: input, shape index: {}, may-alias: {0,1}]   ;;  %s2540_s1 = inlined_call_operand.vmem [shape: f32[2,2,9,9,8], index: 1, kind: input, shape index: {}, may-alias: {0,1}]   ;;  %s2541_s2 = inlined_call_operand.vmem [shape: f32[36,128], index: 2, kind: input, shape index: {}]   ;;  %s2542_s3 = inlined_call_operand.vmem [shape: f32[1,128], index: 3, kind: input, shape index: {}]   ;;  %s2543_s4 = inlined_call_operand.vmem [shape: f32[2,64,128], index: 4, kind: output, shape index: {}]  }
   0x1   :  { %s2153_s17 = smov 0   ;;  %s2155_s18 = smov 0  }
   0x2   :  { %s2157_s19 = smov 0  }
   0x3 LB: > { %s26_s20 = sadd.s32 1, %s2112_s18  ;;  %p42_p1 = scmp.ne.s32.totalorder %s2104_s16, %s2100_s15  ;;  %s2116_s19 = sphi %s2157_s19, %s14_s19   ;;  %s2112_s18 = sphi %s2155_s18, %s2547_s18   ;;  %s2108_s17 = sphi %s2153_s17, %s2546_s17   ;;  %s2104_s16 = sphi %s2151_s16, %s2545_s16   ;;  %s2100_s15 = sphi %s2149_s15, %s2544_s15  }
   0x4   : > { %p28_p0 = scmp.ge.s32.totalorder %s26_s20, 2  ;;  %p43_p2 = scmp.eq.s32.totalorder %s2116_s19, 0 }
   0x5   : > { %s35_s22 = sadd.s32 1, %s2104_s16  ;;  %p1687_p5 = scmp.ge.s32.totalorder %s2116_s19, 2 }
   0x6   : > { %s2549_s20 = smov (%p28_p0, %s26_s20), 0  ;;  %p44_p3 = por %p43_p2, %p42_p1 }
   0x7   : > { %s30_s21 = ssub.s32 %s2112_s18, %s2549_s20  ;;  %176 = sbr.rel (%p1687_p5) target bundleno = 38 (0x26), region = 24 }
   0x8   : > { %p33_p4 = scmp.eq.s32.totalorder %s30_s21, 0 }
   0xa   : > { %s2184_s23 = scalar_select %p33_p4, %s2104_s16, %s35_s22  }
   0xe   : > { %179 = sbr.rel (!%p44_p3) target bundleno = 38 (0x26), region = 28  ;;  %s181_s24 = sand.u32 (%p44_p3), 1, %s2104_s16  }
   0xf   : > { %s1985_s25 = smul.u32 (%p44_p3), 288, %s2112_s18  ;;  %s1688_s26 = sshll.u32 (%p44_p3), %s181_s24, 8 }
  0x10   : > { %s2194_s30 = scalar_lea.vmem (%p44_p3), [#allocation2], %s1688_s26   ;;  %s2196_s5 = smov (%p44_p3), 0  }
  0x11   : > { %s2192_s29 = scalar_lea.vmem (%p44_p3), %s2539_s0, %s1985_s25  }
  0x15 LB: >> { %v325_v0 = vld [vmem:[%s2192_s29] sm:$0xff]  ;;  %v327_v1 = vld [vmem:[%s2192_s29 + $0x8] sm:$0xff]  ;;  %v329_v2 = vld [vmem:[%s2192_s29 + $0x10] sm:$0xff]  ;;  %s319_s5 = sadd.s32 1, %s2120_s5   ;;  %s2120_s5 = sphi %s2196_s5, %s319_s5  }
  0x16   : >> { %326 = vst [vmem:[%s2194_s30] sm:$0xff] %v325_v0  ;;  %328 = vst [vmem:[%s2194_s30 + $0x8] sm:$0xff] %v327_v1  ;;  %v331_v3 = vld [vmem:[%s2192_s29 + $0x18] sm:$0xff]  ;;  %v333_v4 = vld [vmem:[%s2192_s29 + $0x20] sm:$0xff]  ;;  %p318_p6 = scmp.ge.s32.totalorder %s319_s5, 1 }
  0x17   : >> { %330 = vst [vmem:[%s2194_s30 + $0x10] sm:$0xff] %v329_v2  ;;  %v335_v5 = vld [vmem:[%s2192_s29 + $0x28] sm:$0xff]  ;;  %332 = vst [vmem:[%s2194_s30 + $0x18] sm:$0xff] %v331_v3  ;;  %v337_v6 = vld [vmem:[%s2192_s29 + $0x30] sm:$0xff] }
  0x18   : >> { %334 = vst [vmem:[%s2194_s30 + $0x20] sm:$0xff] %v333_v4  ;;  %336 = vst [vmem:[%s2194_s30 + $0x28] sm:$0xff] %v335_v5  ;;  %v339_v7 = vld [vmem:[%s2192_s29 + $0x38] sm:$0xff]  ;;  %v341_v8 = vld [vmem:[%s2192_s29 + $0x40] sm:$0xff] }
  0x19   : >> { %338 = vst [vmem:[%s2194_s30 + $0x30] sm:$0xff] %v337_v6  ;;  %340 = vst [vmem:[%s2194_s30 + $0x38] sm:$0xff] %v339_v7  ;;  %v343_v9 = vld [vmem:[%s2192_s29 + $0x48] sm:$0xff]  ;;  %v345_v10 = vld [vmem:[%s2192_s29 + $0x50] sm:$0xff] }
  0x1a   : >> { %342 = vst [vmem:[%s2194_s30 + $0x40] sm:$0xff] %v341_v8  ;;  %v347_v11 = vld [vmem:[%s2192_s29 + $0x58] sm:$0xff]  ;;  %344 = vst [vmem:[%s2194_s30 + $0x48] sm:$0xff] %v343_v9  ;;  %v349_v12 = vld [vmem:[%s2192_s29 + $0x60] sm:$0xff] }
  0x1b   : >> { %346 = vst [vmem:[%s2194_s30 + $0x50] sm:$0xff] %v345_v10  ;;  %348 = vst [vmem:[%s2194_s30 + $0x58] sm:$0xff] %v347_v11  ;;  %v351_v13 = vld [vmem:[%s2192_s29 + $0x68] sm:$0xff]  ;;  %v353_v14 = vld [vmem:[%s2192_s29 + $0x70] sm:$0xff] }
  0x1c   : >> { %350 = vst [vmem:[%s2194_s30 + $0x60] sm:$0xff] %v349_v12  ;;  %352 = vst [vmem:[%s2194_s30 + $0x68] sm:$0xff] %v351_v13  ;;  %v355_v15 = vld [vmem:[%s2192_s29 + $0x78] sm:$0xff]  ;;  %v357_v16 = vld [vmem:[%s2192_s29 + $0x90] sm:$0xff] }
  0x1d   : >> { %354 = vst [vmem:[%s2194_s30 + $0x70] sm:$0xff] %v353_v14  ;;  %v359_v17 = vld [vmem:[%s2192_s29 + $0x98] sm:$0xff]  ;;  %356 = vst [vmem:[%s2194_s30 + $0x78] sm:$0xff] %v355_v15  ;;  %v361_v18 = vld [vmem:[%s2192_s29 + $0xa0] sm:$0xff] }
  0x1e   : >> { %358 = vst [vmem:[%s2194_s30 + $0x80] sm:$0xff] %v357_v16  ;;  %360 = vst [vmem:[%s2194_s30 + $0x88] sm:$0xff] %v359_v17  ;;  %v363_v19 = vld [vmem:[%s2192_s29 + $0xa8] sm:$0xff]  ;;  %v365_v20 = vld [vmem:[%s2192_s29 + $0xb0] sm:$0xff] }
  0x1f   : >> { %362 = vst [vmem:[%s2194_s30 + $0x90] sm:$0xff] %v361_v18  ;;  %364 = vst [vmem:[%s2194_s30 + $0x98] sm:$0xff] %v363_v19  ;;  %v367_v21 = vld [vmem:[%s2192_s29 + $0xb8] sm:$0xff]  ;;  %v369_v22 = vld [vmem:[%s2192_s29 + $0xc0] sm:$0xff]  ;;  %321 = sbr.rel (!%p318_p6) target bundleno = 21 (0x15), region = 135 }
  0x20   : >> { %366 = vst [vmem:[%s2194_s30 + $0xa0] sm:$0xff] %v365_v20  ;;  %v371_v23 = vld [vmem:[%s2192_s29 + $0xc8] sm:$0xff]  ;;  %368 = vst [vmem:[%s2194_s30 + $0xa8] sm:$0xff] %v367_v21  ;;  %v373_v24 = vld [vmem:[%s2192_s29 + $0xd0] sm:$0xff] }
  0x21   : >> { %370 = vst [vmem:[%s2194_s30 + $0xb0] sm:$0xff] %v369_v22  ;;  %372 = vst [vmem:[%s2194_s30 + $0xb8] sm:$0xff] %v371_v23  ;;  %v375_v25 = vld [vmem:[%s2192_s29 + $0xd8] sm:$0xff]  ;;  %v377_v26 = vld [vmem:[%s2192_s29 + $0xe0] sm:$0xff] }
  0x22   : >> { %374 = vst [vmem:[%s2194_s30 + $0xc0] sm:$0xff] %v373_v24  ;;  %376 = vst [vmem:[%s2194_s30 + $0xc8] sm:$0xff] %v375_v25  ;;  %v379_v27 = vld [vmem:[%s2192_s29 + $0xe8] sm:$0xff]  ;;  %v381_v28 = vld [vmem:[%s2192_s29 + $0xf0] sm:$0xff] }
  0x23   : >> { %378 = vst [vmem:[%s2194_s30 + $0xd0] sm:$0xff] %v377_v26  ;;  %v383_v29 = vld [vmem:[%s2192_s29 + $0xf8] sm:$0xff]  ;;  %380 = vst [vmem:[%s2194_s30 + $0xd8] sm:$0xff] %v379_v27  ;;  %v385_v30 = vld [vmem:[%s2192_s29 + $0x100] sm:$0xff] }
  0x24   : >> { %382 = vst [vmem:[%s2194_s30 + $0xe0] sm:$0xff] %v381_v28  ;;  %384 = vst [vmem:[%s2194_s30 + $0xe8] sm:$0xff] %v383_v29  ;;  %v387_v31 = vld [vmem:[%s2192_s29 + $0x108] sm:$0xff] }
  0x25   : >> { %386 = vst [vmem:[%s2194_s30 + $0xf0] sm:$0xff] %v385_v30  ;;  %388 = vst [vmem:[%s2194_s30 + $0xf8] sm:$0xff] %v387_v31 }
  0x26 PF: > { %p1698_p7 = scmp.ge.s32.totalorder %s2116_s19, 1  ;;  %p443_p8 = scmp.lt.s32.totalorder %s2116_s19, 3 }
  0x28   : > { %p444_p9 = pnand %p1698_p7, %p443_p8 }
  0x29   : > { %v597_v32 = vld [vmem:[%s2541_s2 + $0x8] sm:$0xf] (!%p444_p9)  ;;  %vm615_vm0 = vcmask (!%p444_p9), 1043456   ;;  %s450_s8 = sand.u32 (!%p444_p9), 1, %s2100_s15   ;;  %v2278_v33 = vld [vmem:[%s2541_s2 + $0x20] sm:$0xf] (!%p444_p9) }
  0x2a   : > { %447 = sbr.rel (%p444_p9) target bundleno = 339 (0x153), region = 84  ;;  %1833 = vmatprep.subr.msk.mxu0 (!%p444_p9), %vm615_vm0, %v597_v32  ;;  %s1699_s9 = sshll.u32 (!%p444_p9), %s450_s8, 8  ;;  %vm571_vm1 = vcmask (!%p444_p9), 1046528   ;;  %v2122_v34 = vmov (!%p444_p9), 0.0   ;;  %v596_v35 = vld [vmem:[%s2541_s2] sm:$0xff] (!%p444_p9)  ;;  %vm598_vm2 = vcmask (!%p444_p9), 31744  }
  0x2b   : > { %p498_p10 = scmp.lt.s32.totalorder (!%p444_p9), %s2108_s17, 1  ;;  %1834 = vmatpush3.msk.msra.mxu0 (!%p444_p9), %vm615_vm0, %v597_v32  ;;  %1889 = vmatprep.subr.mxu1 (!%p444_p9), %v2122_v34  ;;  %s2286_s14 = scalar_lea.vmem (!%p444_p9), [#allocation2], %s1699_s9  ;;  %vm2123_vm3 = vmmov (!%p444_p9), 0   ;;  %v887_v48 = vld [vmem:[%s2541_s2 + $0x14] sm:$0xf] (!%p444_p9)  ;;  %v1141_v12 = vld [vmem:[%s2541_s2 + $0x18] sm:$0xff] (!%p444_p9) }
  0x2c   : > { %v2289_v36 = vld [vmem:[%s2286_s14] sm:$0xff] (!%p444_p9)  ;;  %v520_v37 = vld [vmem:[%s2286_s14 + $0x8] sm:$0x1] (!%p444_p9)  ;;  %v2293_v38 = vld [vmem:[%s2286_s14 + $0x10] sm:$0xff] (!%p444_p9)  ;;  %1890 = vmatpush3.msk.msra.mxu1 (!%p444_p9), %vm615_vm0, %v2278_v33  ;;  %1891 = vmatprep.mubr.msk.f32.mxu1 (!%p444_p9), %vm2123_vm3, %v2122_v34  ;;  %vm724_vm4 = vcmask (!%p444_p9), 64512  }
  0x2d   : > { %v572_v39 = vrot.slane (!%p444_p9), %v2289_v36, 1  ;;  %v573_v40 = vrot.slane (!%p444_p9), %v520_v37, 1  ;;  %v522_v41 = vld [vmem:[%s2286_s14 + $0x18] sm:$0x1] (!%p444_p9)  ;;  %v575_v42 = vrot.slane (!%p444_p9), %v2293_v38, 1  ;;  %v2308_v43 = vld [vmem:[%s2286_s14 + $0x20] sm:$0xff] (!%p444_p9)  ;;  %1894 = vmatprep.subr.mxu1 (!%p444_p9), %v2122_v34  ;;  %1847 = vmatprep.subr.mxu0 (!%p444_p9), %v596_v35 }
  0x2e   : > { %v576_v44 = vrot.slane (!%p444_p9), %v522_v41, 1  ;;  %v524_v45 = vld [vmem:[%s2286_s14 + $0x28] sm:$0x1] (!%p444_p9)  ;;  %v578_v46 = vrot.slane (!%p444_p9), %v2308_v43, 1  ;;  %v2314_v47 = vld [vmem:[%s2286_s14 + $0x30] sm:$0xff] (!%p444_p9)  ;;  %v2326_v55 = vld [vmem:[%s2286_s14 + $0x40] sm:$0xff] (!%p444_p9) }
  0x2f   : > { %v574_v49 = vsel (!%p444_p9), %vm571_vm1, %v572_v39, %v573_v40  ;;  %v579_v50 = vrot.slane (!%p444_p9), %v524_v45, 1  ;;  %v526_v51 = vld [vmem:[%s2286_s14 + $0x38] sm:$0x1] (!%p444_p9)  ;;  %v581_v52 = vrot.slane (!%p444_p9), %v2314_v47, 1  ;;  %v528_v56 = vld [vmem:[%s2286_s14 + $0x48] sm:$0x1] (!%p444_p9) }
  0x30   : > { %1835 = vmatprep.mubr.msk.f32.mxu0 (!%p444_p9), %vm598_vm2, %v574_v49  ;;  %v577_v53 = vsel (!%p444_p9), %vm571_vm1, %v575_v42, %v576_v44  ;;  %v582_v54 = vrot.slane (!%p444_p9), %v526_v51, 1  ;;  %v2330_v57 = vld [vmem:[%s2286_s14 + $0x50] sm:$0xff] (!%p444_p9)  ;;  %v584_v59 = vrot.slane (!%p444_p9), %v2326_v55, 1  ;;  %v585_v60 = vrot.slane (!%p444_p9), %v528_v56, 1  ;;  %v530_v61 = vld [vmem:[%s2286_s14 + $0x58] sm:$0x1] (!%p444_p9) }
  0x31   : > { %s2551_s17 = smov (!%p498_p10, %s2108_s17), 1  ;;  %1836 = vmatmul.mubr.msk.f32.vlgmr.msra.gmra.mrb[0].mxu0 %vm598_vm2, %v577_v53  ;;  %v580_v58 = vsel %vm571_vm1, %v578_v46, %v579_v50  ;;  %v587_v63 = vrot.slane %v2330_v57, 1  ;;  %v588_v0 = vrot.slane %v530_v61, 1  ;;  %v2345_v1 = vld [vmem:[%s2286_s14 + $0x60] sm:$0xff]  ;;  %v532_v2 = vld [vmem:[%s2286_s14 + $0x68] sm:$0x1] }
  0x32   : > { %s1987_s22 = smul.u32 288, %s2551_s17  ;;  %1838 = vmatprep.mubr.msk.f32.mxu0 %vm598_vm2, %v580_v58  ;;  %v2338_v62 = vsel %vm571_vm1, %v581_v52, %v582_v54  ;;  %1848 = vmatpush3.msra.mxu0 %v596_v35  ;;  %v2349_v5 = vsel %vm571_vm1, %v584_v59, %v585_v60  ;;  %v590_v6 = vrot.slane %v2345_v1, 1  ;;  %v591_v7 = vrot.slane %v532_v2, 1  ;;  %v2353_v8 = vld [vmem:[%s2286_s14 + $0x70] sm:$0xff]  ;;  %v534_v11 = vld [vmem:[%s2286_s14 + $0x78] sm:$0x1] }
  0x33   : > { %1861 = vmatprep.subr.msk.mxu0 %vm615_vm0, %v887_v48  ;;  %v2366_v14 = vsel %vm571_vm1, %v587_v63, %v588_v0  ;;  %v593_v15 = vrot.slane %v2353_v8, 1  ;;  %v594_v16 = vrot.slane %v534_v11, 1  ;;  %v886_v19 = vld [vmem:[%s2541_s2 + $0xc] sm:$0xff]  ;;  %v2405_v20 = vld [vmem:[%s2286_s14 + $0x80] sm:$0xff]  ;;  %v1704_v21 = vld [vmem:[%s2286_s14 + $0x88] sm:$0x1] }
  0x34   : > { %s1775_s24 = sadd.s32 128, %s1987_s22  ;;  %v2371_v17 = vsel %vm571_vm1, %v590_v6, %v591_v7  ;;  %v862_v22 = vrot.slane %v2405_v20, 1  ;;  %v863_v23 = vrot.slane %v1704_v21, 1  ;;  %v1705_v24 = vld [vmem:[%s2286_s14 + $0x90] sm:$0xff]  ;;  %v1706_v25 = vld [vmem:[%s2286_s14 + $0x98] sm:$0x1] }
  0x35   : > { %s506_s27 = scalar_lea.vmem %s2540_s1, %s1775_s24  ;;  %1839 = vmatmul.mubr.msk.f32.gmra.mrb[2].mxu0 %vm598_vm2, %v2338_v62  ;;  %v2381_v18 = vsel %vm571_vm1, %v593_v15, %v594_v16  ;;  %v1707_v26 = vld [vmem:[%s2286_s14 + $0xa0] sm:$0xff]  ;;  %v1708_v27 = vld [vmem:[%s2286_s14 + $0xa8] sm:$0x1]  ;;  %v865_v28 = vrot.slane %v1705_v24, 1  ;;  %v866_v29 = vrot.slane %v1706_v25, 1  ;;  %v1713_v46 = vld [vmem:[%s2286_s14 + $0xd0] sm:$0xff] }
  0x36   : > { %v552_v3 = vld [vmem:[%s506_s27] sm:$0xff]  ;;  %v553_v4 = vld [vmem:[%s506_s27 + $0x8] sm:$0x1]  ;;  %1841 = vmatprep.mubr.msk.f32.mxu0 %vm598_vm2, %v2349_v5  ;;  %v864_v30 = vsel %vm571_vm1, %v862_v22, %v863_v23  ;;  %v868_v31 = vrot.slane %v1707_v26, 1  ;;  %v869_v32 = vrot.slane %v1708_v27, 1  ;;  %v877_v52 = vrot.slane %v1713_v46, 1 }
  0x37   : > { %v1145_v9 = vrot.slane %v552_v3, 1  ;;  %v1146_v10 = vrot.slane %v553_v4, 1  ;;  %v1710_v35 = vld [vmem:[%s2286_s14 + $0xb8] sm:$0x1]  ;;  %v1712_v37 = vld [vmem:[%s2286_s14 + $0xc8] sm:$0x1]  ;;  %v867_v39 = vsel %vm571_vm1, %v865_v28, %v866_v29 }
  0x38   : > { %v872_v41 = vrot.slane %v1710_v35, 1  ;;  %v870_v42 = vsel %vm571_vm1, %v868_v31, %v869_v32  ;;  %v875_v45 = vrot.slane %v1712_v37, 1  ;;  %v1715_v49 = vld [vmem:[%s2286_s14 + $0xe0] sm:$0xff]  ;;  %v1716_v50 = vld [vmem:[%s2286_s14 + $0xe8] sm:$0x1]  ;;  %v1717_v59 = vld [vmem:[%s2286_s14 + $0xf0] sm:$0xff] }
  0x39   : > { %v1147_v13 = vsel %vm571_vm1, %v1145_v9, %v1146_v10  ;;  %1842 = vmatmul.mubr.msk.f32.gmra.mrb[4].mxu0 %vm598_vm2, %v2366_v14  ;;  %v880_v56 = vrot.slane %v1715_v49, 1  ;;  %v1718_v60 = vld [vmem:[%s2286_s14 + $0xf8] sm:$0x1]  ;;  %s1776_s6 = sshll.u32 %s2551_s17, 6 }
  0x3a   : > { %1892 = vmatmul.mubr.msk.f32.vlgmr.msra.gmra.mrb[0].mxu1 %vm598_vm2, %v1147_v13  ;;  %1844 = vmatprep.mubr.msk.f32.mxu0 %vm598_vm2, %v2371_v17  ;;  %v884_v63 = vrot.slane %v1718_v60, 1  ;;  %s2514_s11 = scalar_lea.vmem %s2543_s4, %s1776_s6 }
  0x3b   : > { %1895 = vmatpush3.msra.mxu1 %v1141_v12  ;;  %1896 = vmatprep.mubr.msk.f32.mxu1 %vm2123_vm3, %v2122_v34 }
  0x3c   : > { %1899 = vmatprep.subr.mxu1 %v2122_v34 }
  0x3d   : > { %1845 = vmatmul.mubr.msk.f32.gmra.mrb[6].mxu0 %vm598_vm2, %v2381_v18 }
  0x3e   : > { %1849 = vmatprep.mubr.msk.f32.mxu0 %vm724_vm4, %v2289_v36  ;;  %v1711_v36 = vld [vmem:[%s2286_s14 + $0xc0] sm:$0xff] }
  0x3f   : > { %v874_v44 = vrot.slane %v1711_v36, 1 }
  0x41   : > { %1850 = vmatmul.mubr.msk.f32.vlgmr.msra.gmra.mrb[0].mxu0 %vm724_vm4, %v2293_v38  ;;  %v876_v54 = vsel %vm571_vm1, %v874_v44, %v875_v45 }
  0x42   : > { %1897 = vmatmul.mubr.msk.f32.vlgmr.msra.gmra.mrb[0].mxu1 %vm724_vm4, %v552_v3  ;;  %1852 = vmatprep.mubr.msk.f32.mxu0 %vm724_vm4, %v2308_v43 }
  0x43   : > { %1900 = vmatpush3.msk.msra.mxu1 %vm615_vm0, %v2278_v33  ;;  %1901 = vmatprep.mubr.msk.f32.mxu1 %vm2123_vm3, %v2122_v34  ;;  %v1709_v33 = vld [vmem:[%s2286_s14 + $0xb0] sm:$0xff] }
  0x44   : > { %1922 = vmatprep.subr.mxu1 %v2122_v34  ;;  %1862 = vmatpush3.msk.msra.mxu0 %vm615_vm0, %v887_v48  ;;  %v871_v40 = vrot.slane %v1709_v33, 1  ;;  %v1714_v48 = vld [vmem:[%s2286_s14 + $0xd8] sm:$0x1] }
  0x45   : > { %1875 = vmatprep.subr.mxu0 %v886_v19  ;;  %1853 = vmatmul.mubr.msk.f32.gmra.mrb[2].mxu0 %vm724_vm4, %v2314_v47 }
  0x46   : > { %1902 = vmatmul.mubr.msk.f32.vlgmr.msra.gmra.mrb[2].mxu1 %vm598_vm2, %v577_v53  ;;  %1855 = vmatprep.mubr.msk.f32.mxu0 %vm724_vm4, %v2326_v55  ;;  %v873_v51 = vsel %vm571_vm1, %v871_v40, %v872_v41  ;;  %v878_v53 = vrot.slane %v1714_v48, 1 }
  0x47   : > { %1923 = vmatpush3.msra.mxu1 %v1141_v12  ;;  %1904 = vmatprep.mubr.msk.f32.mxu1 %vm2123_vm3, %v2122_v34 }
  0x48   : > { %v879_v61 = vsel %vm571_vm1, %v877_v52, %v878_v53 }
  0x49   : > { %1856 = vmatmul.mubr.msk.f32.gmra.mrb[4].mxu0 %vm724_vm4, %v2330_v57 }
  0x4a   : > { %1905 = vmatmul.mubr.msk.f32.gmra.mrb[4].mxu1 %vm598_vm2, %v580_v58  ;;  %1858 = vmatprep.mubr.msk.f32.mxu0 %vm724_vm4, %v2345_v1  ;;  %v881_v58 = vrot.slane %v1716_v50, 1 }
  0x4b   : > { %1907 = vmatprep.mubr.msk.f32.mxu1 %vm2123_vm3, %v2122_v34 }
  0x4c   : > { %v882_v0 = vsel %vm571_vm1, %v880_v56, %v881_v58 }
  0x4d   : > { %1859 = vmatmul.mubr.msk.f32.gmra.mrb[6].mxu0 %vm724_vm4, %v2353_v8 }
  0x4e   : > { %1908 = vmatmul.mubr.msk.f32.gmra.mrb[6].mxu1 %vm598_vm2, %v2338_v62  ;;  %1863 = vmatprep.mubr.msk.f32.mxu0 %vm598_vm2, %v864_v30  ;;  %v883_v62 = vrot.slane %v1717_v59, 1 }
  0x4f   : > { %1910 = vmatprep.mubr.msk.f32.mxu1 %vm2123_vm3, %v2122_v34 }
  0x50   : > { %v885_v2 = vsel %vm571_vm1, %v883_v62, %v884_v63 }
  0x51   : > { %1864 = vmatmul.mubr.msk.f32.vlgmr.msra.gmra.mrb[0].mxu0 %vm598_vm2, %v867_v39 }
  0x52   : > { %1911 = vmatmul.mubr.msk.f32.gmra.mrb[8].mxu1 %vm598_vm2, %v2349_v5  ;;  %1866 = vmatprep.mubr.msk.f32.mxu0 %vm598_vm2, %v870_v42 }
  0x53   : > { %1913 = vmatprep.mubr.msk.f32.mxu1 %vm2123_vm3, %v2122_v34  ;;  %1876 = vmatpush3.msra.mxu0 %v886_v19 }
  0x55   : > { %1867 = vmatmul.mubr.msk.f32.gmra.mrb[2].mxu0 %vm598_vm2, %v873_v51 }
  0x56   : > { %1914 = vmatmul.mubr.msk.f32.gmra.mrb[10].mxu1 %vm598_vm2, %v2366_v14  ;;  %1869 = vmatprep.mubr.msk.f32.mxu0 %vm598_vm2, %v876_v54 }
  0x57   : > { %1916 = vmatprep.mubr.msk.f32.mxu1 %vm2123_vm3, %v2122_v34 }
  0x59   : > { %1870 = vmatmul.mubr.msk.f32.gmra.mrb[4].mxu0 %vm598_vm2, %v879_v61 }
  0x5a   : > { %1917 = vmatmul.mubr.msk.f32.gmra.mrb[12].mxu1 %vm598_vm2, %v2371_v17  ;;  %1872 = vmatprep.mubr.msk.f32.mxu0 %vm598_vm2, %v882_v0 }
  0x5b   : > { %1919 = vmatprep.mubr.msk.f32.mxu1 %vm2123_vm3, %v2122_v34 }
  0x5d   : > { %1873 = vmatmul.mubr.msk.f32.gmra.mrb[6].mxu0 %vm598_vm2, %v885_v2 }
  0x5e   : > { %1920 = vmatmul.mubr.msk.f32.gmra.mrb[14].mxu1 %vm598_vm2, %v2381_v18  ;;  %1877 = vmatprep.mubr.msk.f32.mxu0 %vm724_vm4, %v2405_v20 }
  0x5f   : > { %1924 = vmatprep.mubr.msk.f32.mxu1 %vm2123_vm3, %v2122_v34 }
  0x61   : > { %1878 = vmatmul.mubr.msk.f32.vlgmr.msra.gmra.mrb[0].mxu0 %vm724_vm4, %v1705_v24 }
  0x62   : > { %1925 = vmatmul.mubr.msk.f32.vlgmr.msra.gmra.mrb[2].mxu1 %vm724_vm4, %v2293_v38  ;;  %1880 = vmatprep.mubr.msk.f32.mxu0 %vm724_vm4, %v1707_v26 }
  0x63   : > { %1927 = vmatprep.mubr.msk.f32.mxu1 %vm2123_vm3, %v2122_v34 }
  0x65   : > { %1881 = vmatmul.mubr.msk.f32.gmra.mrb[2].mxu0 %vm724_vm4, %v1709_v33 }
  0x66   : > { %1928 = vmatmul.mubr.msk.f32.gmra.mrb[4].mxu1 %vm724_vm4, %v2308_v43  ;;  %1883 = vmatprep.mubr.msk.f32.mxu0 %vm724_vm4, %v1711_v36 }
  0x67   : > { %1930 = vmatprep.mubr.msk.f32.mxu1 %vm2123_vm3, %v2122_v34 }
  0x69   : > { %1884 = vmatmul.mubr.msk.f32.gmra.mrb[4].mxu0 %vm724_vm4, %v1713_v46 }
  0x6a   : > { %1931 = vmatmul.mubr.msk.f32.gmra.mrb[6].mxu1 %vm724_vm4, %v2314_v47  ;;  %1886 = vmatprep.mubr.msk.f32.mxu0 %vm724_vm4, %v1715_v49 }
  0x6b   : > { %1933 = vmatprep.mubr.msk.f32.mxu1 %vm2123_vm3, %v2122_v34 }
  0x6d   : > { %1887 = vmatmul.mubr.msk.f32.gmra.mrb[6].mxu0 %vm724_vm4, %v1717_v59 }
  0x6e   : > { %1934 = vmatmul.mubr.msk.f32.gmra.mrb[8].mxu1 %vm724_vm4, %v2326_v55 }
  0x6f   : > { %1936 = vmatprep.mubr.msk.f32.mxu1 %vm2123_vm3, %v2122_v34 }
  0x72   : > { %1937 = vmatmul.mubr.msk.f32.gmra.mrb[10].mxu1 %vm724_vm4, %v2330_v57  ;;  %v1771_v57 = vld [vmem:[%s2542_s3] ss:$0 sm:$0xff] }
  0x73   : > { %1939 = vmatprep.mubr.msk.f32.mxu1 %vm2123_vm3, %v2122_v34 }
  0x76   : > { %1940 = vmatmul.mubr.msk.f32.gmra.mrb[12].mxu1 %vm724_vm4, %v2345_v1 }
  0x77   : > { %1942 = vmatprep.mubr.msk.f32.mxu1 %vm2123_vm3, %v2122_v34 }
  0x7a   : > { %1943 = vmatmul.mubr.msk.f32.gmra.mrb[14].mxu1 %vm724_vm4, %v2353_v8 }
 0x115   : > { %v1291_v38 = vpop.f32.mrb[0].mxu1 }
 0x116   : > { %v1898_v43 = vpop.f32.mrb[1].mxu1 }
 0x134   : > { %v1879_v3 = vpop.f32.mrb[0].mxu0 }
 0x135   : > { %v1461_v47 = vpop.f32.mrb[2].mxu1  ;;  %v1094_v4 = vpop.f32.mrb[1].mxu0 }
 0x136   : > { %v1926_v55 = vpop.f32.mrb[3].mxu1  ;;  %v1495_v6 = vadd.f32 %v1461_v47, %v1094_v4 }
 0x138   : > { %v1508_v7 = vadd.f32 %v1771_v57, %v1495_v6  ;;  %v1882_v8 = vpop.f32.mrb[2].mxu0 }
 0x139   : > { %v1466_v5 = vpop.f32.mrb[4].mxu1  ;;  %v1104_v10 = vpop.f32.mrb[3].mxu0 }
 0x13a   : > { %v1496_v34 = vadd.f32 %v1879_v3, %v1466_v5  ;;  %v1929_v1 = vpop.f32.mrb[5].mxu1  ;;  %1515 = vst [vmem:[%s2514_s11] sm:$0xff] %v1508_v7 }
 0x13c   : > { %v1509_v9 = vadd.f32 %v1771_v57, %v1496_v34  ;;  %v1885_v14 = vpop.f32.mrb[4].mxu0 }
 0x13d   : > { %v1471_v11 = vpop.f32.mrb[6].mxu1  ;;  %v1114_v16 = vpop.f32.mrb[5].mxu0 }
 0x13e   : > { %1516 = vst [vmem:[%s2514_s11 + $0x8] sm:$0xff] %v1509_v9  ;;  %v1497_v12 = vadd.f32 %v1471_v11, %v1104_v10  ;;  %v1932_v13 = vpop.f32.mrb[7].mxu1 }
 0x140   : > { %v1510_v15 = vadd.f32 %v1771_v57, %v1497_v12  ;;  %v1888_v20 = vpop.f32.mrb[6].mxu0 }
 0x141   : > { %v1476_v17 = vpop.f32.mrb[8].mxu1  ;;  %v1522_v22 = vadd.f32 %v1888_v20, %v1291_v38  ;;  %v1124_v23 = vpop.f32.mrb[7].mxu0 }
 0x142   : > { %1517 = vst [vmem:[%s2514_s11 + $0x10] sm:$0xff] %v1510_v15  ;;  %v1498_v18 = vadd.f32 %v1882_v8, %v1476_v17  ;;  %v1935_v19 = vpop.f32.mrb[9].mxu1 }
 0x143   : > { %v1523_v25 = vadd.f32 %v1771_v57, %v1522_v22 }
 0x144   : > { %v1511_v21 = vadd.f32 %v1771_v57, %v1498_v18 }
 0x145   : > { %v1481_v24 = vpop.f32.mrb[10].mxu1  ;;  %1524 = vst [vmem:[%s2514_s11 + $0x38] sm:$0xff] %v1523_v25 }
 0x146   : > { %1518 = vst [vmem:[%s2514_s11 + $0x18] sm:$0xff] %v1511_v21  ;;  %v1499_v26 = vadd.f32 %v1481_v24, %v1114_v16  ;;  %v1938_v27 = vpop.f32.mrb[11].mxu1 }
 0x148   : > { %v1512_v28 = vadd.f32 %v1771_v57, %v1499_v26 }
 0x149   : > { %v1486_v29 = vpop.f32.mrb[12].mxu1 }
 0x14a   : > { %1519 = vst [vmem:[%s2514_s11 + $0x20] sm:$0xff] %v1512_v28  ;;  %v1500_v30 = vadd.f32 %v1885_v14, %v1486_v29  ;;  %v1941_v31 = vpop.f32.mrb[13].mxu1 }
 0x14c   : > { %v1513_v32 = vadd.f32 %v1771_v57, %v1500_v30 }
 0x14d   : > { %v1491_v33 = vpop.f32.mrb[14].mxu1 }
 0x14e   : > { %1520 = vst [vmem:[%s2514_s11 + $0x28] sm:$0xff] %v1513_v32  ;;  %v1501_v35 = vadd.f32 %v1491_v33, %v1124_v23  ;;  %v1944_v36 = vpop.f32.mrb[15].mxu1 }
 0x150   : > { %v1514_v37 = vadd.f32 %v1771_v57, %v1501_v35 }
 0x152   : > { %1521 = vst [vmem:[%s2514_s11 + $0x30] sm:$0xff] %v1514_v37 }
 0x153 PF: > { %s14_s19 = sadd.s32 1, %s2116_s19   ;;  %s2544_s15 = smov %s2104_s16 }
 0x154   : > { %p11_p11 = scmp.ge.s32.totalorder %s14_s19, 4   ;;  %s2545_s16 = smov %s2184_s23 }
 0x155   : > { %s2546_s17 = smov %s2112_s18  ;;  %s2547_s18 = smov %s2549_s20 }
 0x156   :  { %13 = sbr.rel (!%p11_p11) target bundleno = 3 (0x3), region = 157 }

// kernel: _lambda_.1
= control target key start
LH: loop header
LB: loop body
LE: loop exit
PB: predicated region body
PF: predicated region fallthrough
CT: control target
= control target key end

     0   :  { %s2149_s15 = smov 0   ;;  %s2151_s16 = smov 0   ;;  %s2539_s0 = inlined_call_operand.vmem [shape: f32[2,2,9,9,8], index: 0, kind: input, shape index: {}, may-alias: {0,1}]   ;;  %s2540_s1 = inlined_call_operand.vmem [shape: f32[2,2,9,9,8], index: 1, kind: input, shape index: {}, may-alias: {0,1}]   ;;  %s2541_s2 = inlined_call_operand.vmem [shape: f32[36,128], index: 2, kind: input, shape index: {}]   ;;  %s2542_s3 = inlined_call_operand.vmem [shape: f32[1,128], index: 3, kind: input, shape index: {}]   ;;  %s2543_s4 = inlined_call_operand.vmem [shape: f32[2,64,128], index: 4, kind: output, shape index: {}]  }
   0x1   :  { %s2153_s17 = smov 0   ;;  %s2155_s18 = smov 0  }
   0x2   :  { %s2157_s19 = smov 0  }
   0x3 LB: > { %s26_s20 = sadd.s32 1, %s2112_s18  ;;  %p42_p1 = scmp.ne.s32.totalorder %s2104_s16, %s2100_s15  ;;  %s2116_s19 = sphi %s2157_s19, %s14_s19   ;;  %s2112_s18 = sphi %s2155_s18, %s2547_s18   ;;  %s2108_s17 = sphi %s2153_s17, %s2546_s17   ;;  %s2104_s16 = sphi %s2151_s16, %s2545_s16   ;;  %s2100_s15 = sphi %s2149_s15, %s2544_s15  }
   0x4   : > { %p28_p0 = scmp.ge.s32.totalorder %s26_s20, 2  ;;  %p43_p2 = scmp.eq.s32.totalorder %s2116_s19, 0 }
   0x5   : > { %s35_s22 = sadd.s32 1, %s2104_s16  ;;  %p1687_p5 = scmp.ge.s32.totalorder %s2116_s19, 2 }
   0x6   : > { %s2549_s20 = smov (%p28_p0, %s26_s20), 0  ;;  %p44_p3 = por %p43_p2, %p42_p1 }
   0x7   : > { %s30_s21 = ssub.s32 %s2112_s18, %s2549_s20  ;;  %176 = sbr.rel (%p1687_p5) target bundleno = 38 (0x26), region = 24 }
   0x8   : > { %p33_p4 = scmp.eq.s32.totalorder %s30_s21, 0 }
   0xa   : > { %s2184_s23 = scalar_select %p33_p4, %s2104_s16, %s35_s22  }
   0xe   : > { %179 = sbr.rel (!%p44_p3) target bundleno = 38 (0x26), region = 28  ;;  %s181_s24 = sand.u32 (%p44_p3), 1, %s2104_s16  }
   0xf   : > { %s1985_s25 = smul.u32 (%p44_p3), 288, %s2112_s18  ;;  %s1688_s26 = sshll.u32 (%p44_p3), %s181_s24, 8 }
  0x10   : > { %s2194_s30 = scalar_lea.vmem (%p44_p3), [#allocation2], %s1688_s26   ;;  %s2196_s5 = smov (%p44_p3), 0  }
  0x11   : > { %s2192_s29 = scalar_lea.vmem (%p44_p3), %s2539_s0, %s1985_s25  }
  0x15 LB: >> { %v325_v0 = vld [vmem:[%s2192_s29] sm:$0xff]  ;;  %v327_v1 = vld [vmem:[%s2192_s29 + $0x8] sm:$0xff]  ;;  %v329_v2 = vld [vmem:[%s2192_s29 + $0x10] sm:$0xff]  ;;  %s319_s5 = sadd.s32 1, %s2120_s5   ;;  %s2120_s5 = sphi %s2196_s5, %s319_s5  }
  0x16   : >> { %326 = vst [vmem:[%s2194_s30] sm:$0xff] %v325_v0  ;;  %328 = vst [vmem:[%s2194_s30 + $0x8] sm:$0xff] %v327_v1  ;;  %v331_v3 = vld [vmem:[%s2192_s29 + $0x18] sm:$0xff]  ;;  %v333_v4 = vld [vmem:[%s2192_s29 + $0x20] sm:$0xff]  ;;  %p318_p6 = scmp.ge.s32.totalorder %s319_s5, 1 }
  0x17   : >> { %330 = vst [vmem:[%s2194_s30 + $0x10] sm:$0xff] %v329_v2  ;;  %v335_v5 = vld [vmem:[%s2192_s29 + $0x28] sm:$0xff]  ;;  %332 = vst [vmem:[%s2194_s30 + $0x18] sm:$0xff] %v331_v3  ;;  %v337_v6 = vld [vmem:[%s2192_s29 + $0x30] sm:$0xff] }
  0x18   : >> { %334 = vst [vmem:[%s2194_s30 + $0x20] sm:$0xff] %v333_v4  ;;  %336 = vst [vmem:[%s2194_s30 + $0x28] sm:$0xff] %v335_v5  ;;  %v339_v7 = vld [vmem:[%s2192_s29 + $0x38] sm:$0xff]  ;;  %v341_v8 = vld [vmem:[%s2192_s29 + $0x40] sm:$0xff] }
  0x19   : >> { %338 = vst [vmem:[%s2194_s30 + $0x30] sm:$0xff] %v337_v6  ;;  %340 = vst [vmem:[%s2194_s30 + $0x38] sm:$0xff] %v339_v7  ;;  %v343_v9 = vld [vmem:[%s2192_s29 + $0x48] sm:$0xff]  ;;  %v345_v10 = vld [vmem:[%s2192_s29 + $0x50] sm:$0xff] }
  0x1a   : >> { %342 = vst [vmem:[%s2194_s30 + $0x40] sm:$0xff] %v341_v8  ;;  %v347_v11 = vld [vmem:[%s2192_s29 + $0x58] sm:$0xff]  ;;  %344 = vst [vmem:[%s2194_s30 + $0x48] sm:$0xff] %v343_v9  ;;  %v349_v12 = vld [vmem:[%s2192_s29 + $0x60] sm:$0xff] }
  0x1b   : >> { %346 = vst [vmem:[%s2194_s30 + $0x50] sm:$0xff] %v345_v10  ;;  %348 = vst [vmem:[%s2194_s30 + $0x58] sm:$0xff] %v347_v11  ;;  %v351_v13 = vld [vmem:[%s2192_s29 + $0x68] sm:$0xff]  ;;  %v353_v14 = vld [vmem:[%s2192_s29 + $0x70] sm:$0xff] }
  0x1c   : >> { %350 = vst [vmem:[%s2194_s30 + $0x60] sm:$0xff] %v349_v12  ;;  %352 = vst [vmem:[%s2194_s30 + $0x68] sm:$0xff] %v351_v13  ;;  %v355_v15 = vld [vmem:[%s2192_s29 + $0x78] sm:$0xff]  ;;  %v357_v16 = vld [vmem:[%s2192_s29 + $0x90] sm:$0xff] }
  0x1d   : >> { %354 = vst [vmem:[%s2194_s30 + $0x70] sm:$0xff] %v353_v14  ;;  %v359_v17 = vld [vmem:[%s2192_s29 + $0x98] sm:$0xff]  ;;  %356 = vst [vmem:[%s2194_s30 + $0x78] sm:$0xff] %v355_v15  ;;  %v361_v18 = vld [vmem:[%s2192_s29 + $0xa0] sm:$0xff] }
  0x1e   : >> { %358 = vst [vmem:[%s2194_s30 + $0x80] sm:$0xff] %v357_v16  ;;  %360 = vst [vmem:[%s2194_s30 + $0x88] sm:$0xff] %v359_v17  ;;  %v363_v19 = vld [vmem:[%s2192_s29 + $0xa8] sm:$0xff]  ;;  %v365_v20 = vld [vmem:[%s2192_s29 + $0xb0] sm:$0xff] }
  0x1f   : >> { %362 = vst [vmem:[%s2194_s30 + $0x90] sm:$0xff] %v361_v18  ;;  %364 = vst [vmem:[%s2194_s30 + $0x98] sm:$0xff] %v363_v19  ;;  %v367_v21 = vld [vmem:[%s2192_s29 + $0xb8] sm:$0xff]  ;;  %v369_v22 = vld [vmem:[%s2192_s29 + $0xc0] sm:$0xff]  ;;  %321 = sbr.rel (!%p318_p6) target bundleno = 21 (0x15), region = 135 }
  0x20   : >> { %366 = vst [vmem:[%s2194_s30 + $0xa0] sm:$0xff] %v365_v20  ;;  %v371_v23 = vld [vmem:[%s2192_s29 + $0xc8] sm:$0xff]  ;;  %368 = vst [vmem:[%s2194_s30 + $0xa8] sm:$0xff] %v367_v21  ;;  %v373_v24 = vld [vmem:[%s2192_s29 + $0xd0] sm:$0xff] }
  0x21   : >> { %370 = vst [vmem:[%s2194_s30 + $0xb0] sm:$0xff] %v369_v22  ;;  %372 = vst [vmem:[%s2194_s30 + $0xb8] sm:$0xff] %v371_v23  ;;  %v375_v25 = vld [vmem:[%s2192_s29 + $0xd8] sm:$0xff]  ;;  %v377_v26 = vld [vmem:[%s2192_s29 + $0xe0] sm:$0xff] }
  0x22   : >> { %374 = vst [vmem:[%s2194_s30 + $0xc0] sm:$0xff] %v373_v24  ;;  %376 = vst [vmem:[%s2194_s30 + $0xc8] sm:$0xff] %v375_v25  ;;  %v379_v27 = vld [vmem:[%s2192_s29 + $0xe8] sm:$0xff]  ;;  %v381_v28 = vld [vmem:[%s2192_s29 + $0xf0] sm:$0xff] }
  0x23   : >> { %378 = vst [vmem:[%s2194_s30 + $0xd0] sm:$0xff] %v377_v26  ;;  %v383_v29 = vld [vmem:[%s2192_s29 + $0xf8] sm:$0xff]  ;;  %380 = vst [vmem:[%s2194_s30 + $0xd8] sm:$0xff] %v379_v27  ;;  %v385_v30 = vld [vmem:[%s2192_s29 + $0x100] sm:$0xff] }
  0x24   : >> { %382 = vst [vmem:[%s2194_s30 + $0xe0] sm:$0xff] %v381_v28  ;;  %384 = vst [vmem:[%s2194_s30 + $0xe8] sm:$0xff] %v383_v29  ;;  %v387_v31 = vld [vmem:[%s2192_s29 + $0x108] sm:$0xff] }
  0x25   : >> { %386 = vst [vmem:[%s2194_s30 + $0xf0] sm:$0xff] %v385_v30  ;;  %388 = vst [vmem:[%s2194_s30 + $0xf8] sm:$0xff] %v387_v31 }
  0x26 PF: > { %p1698_p7 = scmp.ge.s32.totalorder %s2116_s19, 1  ;;  %p443_p8 = scmp.lt.s32.totalorder %s2116_s19, 3 }
  0x28   : > { %p444_p9 = pnand %p1698_p7, %p443_p8 }
  0x29   : > { %v597_v32 = vld [vmem:[%s2541_s2 + $0x8] sm:$0xf] (!%p444_p9)  ;;  %vm615_vm0 = vcmask (!%p444_p9), 1043456   ;;  %s450_s8 = sand.u32 (!%p444_p9), 1, %s2100_s15   ;;  %v2278_v33 = vld [vmem:[%s2541_s2 + $0x20] sm:$0xf] (!%p444_p9) }
  0x2a   : > { %447 = sbr.rel (%p444_p9) target bundleno = 339 (0x153), region = 84  ;;  %1833 = vmatprep.subr.msk.mxu0 (!%p444_p9), %vm615_vm0, %v597_v32  ;;  %s1699_s9 = sshll.u32 (!%p444_p9), %s450_s8, 8  ;;  %vm571_vm1 = vcmask (!%p444_p9), 1046528   ;;  %v2122_v34 = vmov (!%p444_p9), 0.0   ;;  %v596_v35 = vld [vmem:[%s2541_s2] sm:$0xff] (!%p444_p9)  ;;  %vm598_vm2 = vcmask (!%p444_p9), 31744  }
  0x2b   : > { %p498_p10 = scmp.lt.s32.totalorder (!%p444_p9), %s2108_s17, 1  ;;  %1834 = vmatpush3.msk.msra.mxu0 (!%p444_p9), %vm615_vm0, %v597_v32  ;;  %1889 = vmatprep.subr.mxu1 (!%p444_p9), %v2122_v34  ;;  %s2286_s14 = scalar_lea.vmem (!%p444_p9), [#allocation2], %s1699_s9  ;;  %vm2123_vm3 = vmmov (!%p444_p9), 0   ;;  %v887_v48 = vld [vmem:[%s2541_s2 + $0x14] sm:$0xf] (!%p444_p9)  ;;  %v1141_v12 = vld [vmem:[%s2541_s2 + $0x18] sm:$0xff] (!%p444_p9) }
  0x2c   : > { %v2289_v36 = vld [vmem:[%s2286_s14] sm:$0xff] (!%p444_p9)  ;;  %v520_v37 = vld [vmem:[%s2286_s14 + $0x8] sm:$0x1] (!%p444_p9)  ;;  %v2293_v38 = vld [vmem:[%s2286_s14 + $0x10] sm:$0xff] (!%p444_p9)  ;;  %1890 = vmatpush3.msk.msra.mxu1 (!%p444_p9), %vm615_vm0, %v2278_v33  ;;  %1891 = vmatprep.mubr.msk.f32.mxu1 (!%p444_p9), %vm2123_vm3, %v2122_v34  ;;  %vm724_vm4 = vcmask (!%p444_p9), 64512  }
  0x2d   : > { %v572_v39 = vrot.slane (!%p444_p9), %v2289_v36, 1  ;;  %v573_v40 = vrot.slane (!%p444_p9), %v520_v37, 1  ;;  %v522_v41 = vld [vmem:[%s2286_s14 + $0x18] sm:$0x1] (!%p444_p9)  ;;  %v575_v42 = vrot.slane (!%p444_p9), %v2293_v38, 1  ;;  %v2308_v43 = vld [vmem:[%s2286_s14 + $0x20] sm:$0xff] (!%p444_p9)  ;;  %1894 = vmatprep.subr.mxu1 (!%p444_p9), %v2122_v34  ;;  %1847 = vmatprep.subr.mxu0 (!%p444_p9), %v596_v35 }
  0x2e   : > { %v576_v44 = vrot.slane (!%p444_p9), %v522_v41, 1  ;;  %v524_v45 = vld [vmem:[%s2286_s14 + $0x28] sm:$0x1] (!%p444_p9)  ;;  %v578_v46 = vrot.slane (!%p444_p9), %v2308_v43, 1  ;;  %v2314_v47 = vld [vmem:[%s2286_s14 + $0x30] sm:$0xff] (!%p444_p9)  ;;  %v2326_v55 = vld [vmem:[%s2286_s14 + $0x40] sm:$0xff] (!%p444_p9) }
  0x2f   : > { %v574_v49 = vsel (!%p444_p9), %vm571_vm1, %v572_v39, %v573_v40  ;;  %v579_v50 = vrot.slane (!%p444_p9), %v524_v45, 1  ;;  %v526_v51 = vld [vmem:[%s2286_s14 + $0x38] sm:$0x1] (!%p444_p9)  ;;  %v581_v52 = vrot.slane (!%p444_p9), %v2314_v47, 1  ;;  %v528_v56 = vld [vmem:[%s2286_s14 + $0x48] sm:$0x1] (!%p444_p9) }
  0x30   : > { %1835 = vmatprep.mubr.msk.f32.mxu0 (!%p444_p9), %vm598_vm2, %v574_v49  ;;  %v577_v53 = vsel (!%p444_p9), %vm571_vm1, %v575_v42, %v576_v44  ;;  %v582_v54 = vrot.slane (!%p444_p9), %v526_v51, 1  ;;  %v2330_v57 = vld [vmem:[%s2286_s14 + $0x50] sm:$0xff] (!%p444_p9)  ;;  %v584_v59 = vrot.slane (!%p444_p9), %v2326_v55, 1  ;;  %v585_v60 = vrot.slane (!%p444_p9), %v528_v56, 1  ;;  %v530_v61 = vld [vmem:[%s2286_s14 + $0x58] sm:$0x1] (!%p444_p9) }
  0x31   : > { %s2551_s17 = smov (!%p498_p10, %s2108_s17), 1  ;;  %1836 = vmatmul.mubr.msk.f32.vlgmr.msra.gmra.mrb[0].mxu0 %vm598_vm2, %v577_v53  ;;  %v580_v58 = vsel %vm571_vm1, %v578_v46, %v579_v50  ;;  %v587_v63 = vrot.slane %v2330_v57, 1  ;;  %v588_v0 = vrot.slane %v530_v61, 1  ;;  %v2345_v1 = vld [vmem:[%s2286_s14 + $0x60] sm:$0xff]  ;;  %v532_v2 = vld [vmem:[%s2286_s14 + $0x68] sm:$0x1] }
  0x32   : > { %s1987_s22 = smul.u32 288, %s2551_s17  ;;  %1838 = vmatprep.mubr.msk.f32.mxu0 %vm598_vm2, %v580_v58  ;;  %v2338_v62 = vsel %vm571_vm1, %v581_v52, %v582_v54  ;;  %1848 = vmatpush3.msra.mxu0 %v596_v35  ;;  %v2349_v5 = vsel %vm571_vm1, %v584_v59, %v585_v60  ;;  %v590_v6 = vrot.slane %v2345_v1, 1  ;;  %v591_v7 = vrot.slane %v532_v2, 1  ;;  %v2353_v8 = vld [vmem:[%s2286_s14 + $0x70] sm:$0xff]  ;;  %v534_v11 = vld [vmem:[%s2286_s14 + $0x78] sm:$0x1] }
  0x33   : > { %1861 = vmatprep.subr.msk.mxu0 %vm615_vm0, %v887_v48  ;;  %v2366_v14 = vsel %vm571_vm1, %v587_v63, %v588_v0  ;;  %v593_v15 = vrot.slane %v2353_v8, 1  ;;  %v594_v16 = vrot.slane %v534_v11, 1  ;;  %v886_v19 = vld [vmem:[%s2541_s2 + $0xc] sm:$0xff]  ;;  %v2405_v20 = vld [vmem:[%s2286_s14 + $0x80] sm:$0xff]  ;;  %v1704_v21 = vld [vmem:[%s2286_s14 + $0x88] sm:$0x1] }
  0x34   : > { %s1775_s24 = sadd.s32 128, %s1987_s22  ;;  %v2371_v17 = vsel %vm571_vm1, %v590_v6, %v591_v7  ;;  %v862_v22 = vrot.slane %v2405_v20, 1  ;;  %v863_v23 = vrot.slane %v1704_v21, 1  ;;  %v1705_v24 = vld [vmem:[%s2286_s14 + $0x90] sm:$0xff]  ;;  %v1706_v25 = vld [vmem:[%s2286_s14 + $0x98] sm:$0x1] }
  0x35   : > { %s506_s27 = scalar_lea.vmem %s2540_s1, %s1775_s24  ;;  %1839 = vmatmul.mubr.msk.f32.gmra.mrb[2].mxu0 %vm598_vm2, %v2338_v62  ;;  %v2381_v18 = vsel %vm571_vm1, %v593_v15, %v594_v16  ;;  %v1707_v26 = vld [vmem:[%s2286_s14 + $0xa0] sm:$0xff]  ;;  %v1708_v27 = vld [vmem:[%s2286_s14 + $0xa8] sm:$0x1]  ;;  %v865_v28 = vrot.slane %v1705_v24, 1  ;;  %v866_v29 = vrot.slane %v1706_v25, 1  ;;  %v1713_v46 = vld [vmem:[%s2286_s14 + $0xd0] sm:$0xff] }
  0x36   : > { %v552_v3 = vld [vmem:[%s506_s27] sm:$0xff]  ;;  %v553_v4 = vld [vmem:[%s506_s27 + $0x8] sm:$0x1]  ;;  %1841 = vmatprep.mubr.msk.f32.mxu0 %vm598_vm2, %v2349_v5  ;;  %v864_v30 = vsel %vm571_vm1, %v862_v22, %v863_v23  ;;  %v868_v31 = vrot.slane %v1707_v26, 1  ;;  %v869_v32 = vrot.slane %v1708_v27, 1  ;;  %v877_v52 = vrot.slane %v1713_v46, 1 }
  0x37   : > { %v1145_v9 = vrot.slane %v552_v3, 1  ;;  %v1146_v10 = vrot.slane %v553_v4, 1  ;;  %v1710_v35 = vld [vmem:[%s2286_s14 + $0xb8] sm:$0x1]  ;;  %v1712_v37 = vld [vmem:[%s2286_s14 + $0xc8] sm:$0x1]  ;;  %v867_v39 = vsel %vm571_vm1, %v865_v28, %v866_v29 }
  0x38   : > { %v872_v41 = vrot.slane %v1710_v35, 1  ;;  %v870_v42 = vsel %vm571_vm1, %v868_v31, %v869_v32  ;;  %v875_v45 = vrot.slane %v1712_v37, 1  ;;  %v1715_v49 = vld [vmem:[%s2286_s14 + $0xe0] sm:$0xff]  ;;  %v1716_v50 = vld [vmem:[%s2286_s14 + $0xe8] sm:$0x1]  ;;  %v1717_v59 = vld [vmem:[%s2286_s14 + $0xf0] sm:$0xff] }
  0x39   : > { %v1147_v13 = vsel %vm571_vm1, %v1145_v9, %v1146_v10  ;;  %1842 = vmatmul.mubr.msk.f32.gmra.mrb[4].mxu0 %vm598_vm2, %v2366_v14  ;;  %v880_v56 = vrot.slane %v1715_v49, 1  ;;  %v1718_v60 = vld [vmem:[%s2286_s14 + $0xf8] sm:$0x1]  ;;  %s1776_s6 = sshll.u32 %s2551_s17, 6 }
  0x3a   : > { %1892 = vmatmul.mubr.msk.f32.vlgmr.msra.gmra.mrb[0].mxu1 %vm598_vm2, %v1147_v13  ;;  %1844 = vmatprep.mubr.msk.f32.mxu0 %vm598_vm2, %v2371_v17  ;;  %v884_v63 = vrot.slane %v1718_v60, 1  ;;  %s2514_s11 = scalar_lea.vmem %s2543_s4, %s1776_s6 }
  0x3b   : > { %1895 = vmatpush3.msra.mxu1 %v1141_v12  ;;  %1896 = vmatprep.mubr.msk.f32.mxu1 %vm2123_vm3, %v2122_v34 }
  0x3c   : > { %1899 = vmatprep.subr.mxu1 %v2122_v34 }
  0x3d   : > { %1845 = vmatmul.mubr.msk.f32.gmra.mrb[6].mxu0 %vm598_vm2, %v2381_v18 }
  0x3e   : > { %1849 = vmatprep.mubr.msk.f32.mxu0 %vm724_vm4, %v2289_v36  ;;  %v1711_v36 = vld [vmem:[%s2286_s14 + $0xc0] sm:$0xff] }
  0x3f   : > { %v874_v44 = vrot.slane %v1711_v36, 1 }
  0x41   : > { %1850 = vmatmul.mubr.msk.f32.vlgmr.msra.gmra.mrb[0].mxu0 %vm724_vm4, %v2293_v38  ;;  %v876_v54 = vsel %vm571_vm1, %v874_v44, %v875_v45 }
  0x42   : > { %1897 = vmatmul.mubr.msk.f32.vlgmr.msra.gmra.mrb[0].mxu1 %vm724_vm4, %v552_v3  ;;  %1852 = vmatprep.mubr.msk.f32.mxu0 %vm724_vm4, %v2308_v43 }
  0x43   : > { %1900 = vmatpush3.msk.msra.mxu1 %vm615_vm0, %v2278_v33  ;;  %1901 = vmatprep.mubr.msk.f32.mxu1 %vm2123_vm3, %v2122_v34  ;;  %v1709_v33 = vld [vmem:[%s2286_s14 + $0xb0] sm:$0xff] }
  0x44   : > { %1922 = vmatprep.subr.mxu1 %v2122_v34  ;;  %1862 = vmatpush3.msk.msra.mxu0 %vm615_vm0, %v887_v48  ;;  %v871_v40 = vrot.slane %v1709_v33, 1  ;;  %v1714_v48 = vld [vmem:[%s2286_s14 + $0xd8] sm:$0x1] }
  0x45   : > { %1875 = vmatprep.subr.mxu0 %v886_v19  ;;  %1853 = vmatmul.mubr.msk.f32.gmra.mrb[2].mxu0 %vm724_vm4, %v2314_v47 }
  0x46   : > { %1902 = vmatmul.mubr.msk.f32.vlgmr.msra.gmra.mrb[2].mxu1 %vm598_vm2, %v577_v53  ;;  %1855 = vmatprep.mubr.msk.f32.mxu0 %vm724_vm4, %v2326_v55  ;;  %v873_v51 = vsel %vm571_vm1, %v871_v40, %v872_v41  ;;  %v878_v53 = vrot.slane %v1714_v48, 1 }
  0x47   : > { %1923 = vmatpush3.msra.mxu1 %v1141_v12  ;;  %1904 = vmatprep.mubr.msk.f32.mxu1 %vm2123_vm3, %v2122_v34 }
  0x48   : > { %v879_v61 = vsel %vm571_vm1, %v877_v52, %v878_v53 }
  0x49   : > { %1856 = vmatmul.mubr.msk.f32.gmra.mrb[4].mxu0 %vm724_vm4, %v2330_v57 }
  0x4a   : > { %1905 = vmatmul.mubr.msk.f32.gmra.mrb[4].mxu1 %vm598_vm2, %v580_v58  ;;  %1858 = vmatprep.mubr.msk.f32.mxu0 %vm724_vm4, %v2345_v1  ;;  %v881_v58 = vrot.slane %v1716_v50, 1 }
  0x4b   : > { %1907 = vmatprep.mubr.msk.f32.mxu1 %vm2123_vm3, %v2122_v34 }
  0x4c   : > { %v882_v0 = vsel %vm571_vm1, %v880_v56, %v881_v58 }
  0x4d   : > { %1859 = vmatmul.mubr.msk.f32.gmra.mrb[6].mxu0 %vm724_vm4, %v2353_v8 }
  0x4e   : > { %1908 = vmatmul.mubr.msk.f32.gmra.mrb[6].mxu1 %vm598_vm2, %v2338_v62  ;;  %1863 = vmatprep.mubr.msk.f32.mxu0 %vm598_vm2, %v864_v30  ;;  %v883_v62 = vrot.slane %v1717_v59, 1 }
  0x4f   : > { %1910 = vmatprep.mubr.msk.f32.mxu1 %vm2123_vm3, %v2122_v34 }
  0x50   : > { %v885_v2 = vsel %vm571_vm1, %v883_v62, %v884_v63 }
  0x51   : > { %1864 = vmatmul.mubr.msk.f32.vlgmr.msra.gmra.mrb[0].mxu0 %vm598_vm2, %v867_v39 }
  0x52   : > { %1911 = vmatmul.mubr.msk.f32.gmra.mrb[8].mxu1 %vm598_vm2, %v2349_v5  ;;  %1866 = vmatprep.mubr.msk.f32.mxu0 %vm598_vm2, %v870_v42 }
  0x53   : > { %1913 = vmatprep.mubr.msk.f32.mxu1 %vm2123_vm3, %v2122_v34  ;;  %1876 = vmatpush3.msra.mxu0 %v886_v19 }
  0x55   : > { %1867 = vmatmul.mubr.msk.f32.gmra.mrb[2].mxu0 %vm598_vm2, %v873_v51 }
  0x56   : > { %1914 = vmatmul.mubr.msk.f32.gmra.mrb[10].mxu1 %vm598_vm2, %v2366_v14  ;;  %1869 = vmatprep.mubr.msk.f32.mxu0 %vm598_vm2, %v876_v54 }
  0x57   : > { %1916 = vmatprep.mubr.msk.f32.mxu1 %vm2123_vm3, %v2122_v34 }
  0x59   : > { %1870 = vmatmul.mubr.msk.f32.gmra.mrb[4].mxu0 %vm598_vm2, %v879_v61 }
  0x5a   : > { %1917 = vmatmul.mubr.msk.f32.gmra.mrb[12].mxu1 %vm598_vm2, %v2371_v17  ;;  %1872 = vmatprep.mubr.msk.f32.mxu0 %vm598_vm2, %v882_v0 }
  0x5b   : > { %1919 = vmatprep.mubr.msk.f32.mxu1 %vm2123_vm3, %v2122_v34 }
  0x5d   : > { %1873 = vmatmul.mubr.msk.f32.gmra.mrb[6].mxu0 %vm598_vm2, %v885_v2 }
  0x5e   : > { %1920 = vmatmul.mubr.msk.f32.gmra.mrb[14].mxu1 %vm598_vm2, %v2381_v18  ;;  %1877 = vmatprep.mubr.msk.f32.mxu0 %vm724_vm4, %v2405_v20 }
  0x5f   : > { %1924 = vmatprep.mubr.msk.f32.mxu1 %vm2123_vm3, %v2122_v34 }
  0x61   : > { %1878 = vmatmul.mubr.msk.f32.vlgmr.msra.gmra.mrb[0].mxu0 %vm724_vm4, %v1705_v24 }
  0x62   : > { %1925 = vmatmul.mubr.msk.f32.vlgmr.msra.gmra.mrb[2].mxu1 %vm724_vm4, %v2293_v38  ;;  %1880 = vmatprep.mubr.msk.f32.mxu0 %vm724_vm4, %v1707_v26 }
  0x63   : > { %1927 = vmatprep.mubr.msk.f32.mxu1 %vm2123_vm3, %v2122_v34 }
  0x65   : > { %1881 = vmatmul.mubr.msk.f32.gmra.mrb[2].mxu0 %vm724_vm4, %v1709_v33 }
  0x66   : > { %1928 = vmatmul.mubr.msk.f32.gmra.mrb[4].mxu1 %vm724_vm4, %v2308_v43  ;;  %1883 = vmatprep.mubr.msk.f32.mxu0 %vm724_vm4, %v1711_v36 }
  0x67   : > { %1930 = vmatprep.mubr.msk.f32.mxu1 %vm2123_vm3, %v2122_v34 }
  0x69   : > { %1884 = vmatmul.mubr.msk.f32.gmra.mrb[4].mxu0 %vm724_vm4, %v1713_v46 }
  0x6a   : > { %1931 = vmatmul.mubr.msk.f32.gmra.mrb[6].mxu1 %vm724_vm4, %v2314_v47  ;;  %1886 = vmatprep.mubr.msk.f32.mxu0 %vm724_vm4, %v1715_v49 }
  0x6b   : > { %1933 = vmatprep.mubr.msk.f32.mxu1 %vm2123_vm3, %v2122_v34 }
  0x6d   : > { %1887 = vmatmul.mubr.msk.f32.gmra.mrb[6].mxu0 %vm724_vm4, %v1717_v59 }
  0x6e   : > { %1934 = vmatmul.mubr.msk.f32.gmra.mrb[8].mxu1 %vm724_vm4, %v2326_v55 }
  0x6f   : > { %1936 = vmatprep.mubr.msk.f32.mxu1 %vm2123_vm3, %v2122_v34 }
  0x72   : > { %1937 = vmatmul.mubr.msk.f32.gmra.mrb[10].mxu1 %vm724_vm4, %v2330_v57  ;;  %v1771_v57 = vld [vmem:[%s2542_s3] ss:$0 sm:$0xff] }
  0x73   : > { %1939 = vmatprep.mubr.msk.f32.mxu1 %vm2123_vm3, %v2122_v34 }
  0x76   : > { %1940 = vmatmul.mubr.msk.f32.gmra.mrb[12].mxu1 %vm724_vm4, %v2345_v1 }
  0x77   : > { %1942 = vmatprep.mubr.msk.f32.mxu1 %vm2123_vm3, %v2122_v34 }
  0x7a   : > { %1943 = vmatmul.mubr.msk.f32.gmra.mrb[14].mxu1 %vm724_vm4, %v2353_v8 }
 0x115   : > { %v1291_v38 = vpop.f32.mrb[0].mxu1 }
 0x116   : > { %v1898_v43 = vpop.f32.mrb[1].mxu1 }
 0x134   : > { %v1879_v3 = vpop.f32.mrb[0].mxu0 }
 0x135   : > { %v1461_v47 = vpop.f32.mrb[2].mxu1  ;;  %v1094_v4 = vpop.f32.mrb[1].mxu0 }
 0x136   : > { %v1926_v55 = vpop.f32.mrb[3].mxu1  ;;  %v1495_v6 = vadd.f32 %v1461_v47, %v1094_v4 }
 0x138   : > { %v1508_v7 = vadd.f32 %v1771_v57, %v1495_v6  ;;  %v1882_v8 = vpop.f32.mrb[2].mxu0 }
 0x139   : > { %v1466_v5 = vpop.f32.mrb[4].mxu1  ;;  %v1104_v10 = vpop.f32.mrb[3].mxu0 }
 0x13a   : > { %v1496_v34 = vadd.f32 %v1879_v3, %v1466_v5  ;;  %v1929_v1 = vpop.f32.mrb[5].mxu1  ;;  %1515 = vst [vmem:[%s2514_s11] sm:$0xff] %v1508_v7 }
 0x13c   : > { %v1509_v9 = vadd.f32 %v1771_v57, %v1496_v34  ;;  %v1885_v14 = vpop.f32.mrb[4].mxu0 }
 0x13d   : > { %v1471_v11 = vpop.f32.mrb[6].mxu1  ;;  %v1114_v16 = vpop.f32.mrb[5].mxu0 }
 0x13e   : > { %1516 = vst [vmem:[%s2514_s11 + $0x8] sm:$0xff] %v1509_v9  ;;  %v1497_v12 = vadd.f32 %v1471_v11, %v1104_v10  ;;  %v1932_v13 = vpop.f32.mrb[7].mxu1 }
 0x140   : > { %v1510_v15 = vadd.f32 %v1771_v57, %v1497_v12  ;;  %v1888_v20 = vpop.f32.mrb[6].mxu0 }
 0x141   : > { %v1476_v17 = vpop.f32.mrb[8].mxu1  ;;  %v1522_v22 = vadd.f32 %v1888_v20, %v1291_v38  ;;  %v1124_v23 = vpop.f32.mrb[7].mxu0 }
 0x142   : > { %1517 = vst [vmem:[%s2514_s11 + $0x10] sm:$0xff] %v1510_v15  ;;  %v1498_v18 = vadd.f32 %v1882_v8, %v1476_v17  ;;  %v1935_v19 = vpop.f32.mrb[9].mxu1 }
 0x143   : > { %v1523_v25 = vadd.f32 %v1771_v57, %v1522_v22 }
 0x144   : > { %v1511_v21 = vadd.f32 %v1771_v57, %v1498_v18 }
 0x145   : > { %v1481_v24 = vpop.f32.mrb[10].mxu1  ;;  %1524 = vst [vmem:[%s2514_s11 + $0x38] sm:$0xff] %v1523_v25 }
 0x146   : > { %1518 = vst [vmem:[%s2514_s11 + $0x18] sm:$0xff] %v1511_v21  ;;  %v1499_v26 = vadd.f32 %v1481_v24, %v1114_v16  ;;  %v1938_v27 = vpop.f32.mrb[11].mxu1 }
 0x148   : > { %v1512_v28 = vadd.f32 %v1771_v57, %v1499_v26 }
 0x149   : > { %v1486_v29 = vpop.f32.mrb[12].mxu1 }
 0x14a   : > { %1519 = vst [vmem:[%s2514_s11 + $0x20] sm:$0xff] %v1512_v28  ;;  %v1500_v30 = vadd.f32 %v1885_v14, %v1486_v29  ;;  %v1941_v31 = vpop.f32.mrb[13].mxu1 }
 0x14c   : > { %v1513_v32 = vadd.f32 %v1771_v57, %v1500_v30 }
 0x14d   : > { %v1491_v33 = vpop.f32.mrb[14].mxu1 }
 0x14e   : > { %1520 = vst [vmem:[%s2514_s11 + $0x28] sm:$0xff] %v1513_v32  ;;  %v1501_v35 = vadd.f32 %v1491_v33, %v1124_v23  ;;  %v1944_v36 = vpop.f32.mrb[15].mxu1 }
 0x150   : > { %v1514_v37 = vadd.f32 %v1771_v57, %v1501_v35 }
 0x152   : > { %1521 = vst [vmem:[%s2514_s11 + $0x30] sm:$0xff] %v1514_v37 }
 0x153 PF: > { %s14_s19 = sadd.s32 1, %s2116_s19   ;;  %s2544_s15 = smov %s2104_s16 }
 0x154   : > { %p11_p11 = scmp.ge.s32.totalorder %s14_s19, 4   ;;  %s2545_s16 = smov %s2184_s23 }
 0x155   : > { %s2546_s17 = smov %s2112_s18  ;;  %s2547_s18 = smov %s2549_s20 }
 0x156   :  { %13 = sbr.rel (!%p11_p11) target bundleno = 3 (0x3), region = 157 }

</bundles_post_ra>
